<compile_context>
chip_gen: v7x
topology: tpu7x:2x2x1
jax: 0.10.0
libtpu: 0.0.40
codegen_flags: <defaults>
</compile_context>

<pallas_src>
import functools

import jax
import jax.numpy as jnp
from jax.experimental import pallas as pl
from jax.experimental.pallas import tpu as pltpu

_LN_EPS = 1e-12


def _layernorm(x, gamma, beta, eps):
    mean = jnp.mean(x, axis=-1, keepdims=True)
    xc = x - mean
    var = jnp.mean(xc * xc, axis=-1, keepdims=True)
    return xc * jax.lax.rsqrt(var + eps) * gamma + beta


def _fused_forward_kernel(
    # inputs (one grid step == one batch element)
    x_ref,                                    # [1, 1, E]
    aw_ref, ab_ref,                           # adapter [E, S*H], [1, S*H]
    pos_ref, tok_ref, elng_ref, elnb_ref,     # embeddings [S,H],[1,H],[1,H],[1,H]
    wqkv_ref, bqkv_ref,                       # [L, H, 3H], [L, 1, 3H]
    wo_ref, bo_ref, ln1g_ref, ln1b_ref,       # [L, H, H], [L,1,H] x3
    w1_ref, b1_ref, w2_ref, b2_ref,           # [L, H, I], [L,1,I], [L, I, H], [L,1,H]
    ln2g_ref, ln2b_ref,                       # [L, 1, H] x2
    wih_ref, whh_ref, lb_ref,                 # LSTM [H, 4U], [U, 4U], [1, 4U]
    ow_ref, ob_ref,                           # output [S*U, E], [1, E]
    o_ref,                                    # out [1, 1, E]
    *, S, H, nH, U, L, eps):
    f32, bf16 = jnp.float32, jnp.bfloat16
    dH = H // nH
    scale = 1.0 / float(dH) ** 0.5

    # ---- 1) embedding adapter: [1,E] @ [E,S*H] -> [S,H] (lane slices -> rows) ----
    x = x_ref[0].astype(bf16)                                             # [1, E]
    h_flat = jnp.dot(x, aw_ref[...], preferred_element_type=f32) + ab_ref[...]
    h = jnp.concatenate([h_flat[:, s * H:(s + 1) * H] for s in range(S)], axis=0)  # [S, H]

    # ---- 2) BERT embeddings: inputs_embeds + position + token-type-0, LayerNorm ----
    #        (dropout omitted: inference semantics)
    hs = _layernorm(h + pos_ref[...] + tok_ref[...], elng_ref[...], elnb_ref[...], eps)

    # ---- 3) encoder layers (static L) ----
    for l in range(L):
        qkv = jnp.dot(hs.astype(bf16), wqkv_ref[l],
                      preferred_element_type=f32) + bqkv_ref[l]           # [S, 3H]
        # head split: [nH, S, dH] built from lane slices (no in-kernel reshape)
        q = jnp.stack([qkv[:, h_ * dH:(h_ + 1) * dH] for h_ in range(nH)], axis=0)
        k = jnp.stack([qkv[:, H + h_ * dH:H + (h_ + 1) * dH] for h_ in range(nH)], axis=0)
        v = jnp.stack([qkv[:, 2 * H + h_ * dH:2 * H + (h_ + 1) * dH] for h_ in range(nH)], axis=0)
        # head-batched score / context matmuls (2 MXU issues, not 2*nH micro-matmuls)
        s = jnp.einsum("hqd,hkd->hqk", q.astype(bf16), k.astype(bf16),
                       preferred_element_type=f32) * scale                # [nH, S, S]
        s = s - jnp.max(s, axis=-1, keepdims=True)
        p = jnp.exp(s)
        p = p * pl.reciprocal(jnp.sum(p, axis=-1, keepdims=True), approx=True)
        ctx = jnp.einsum("hqk,hkd->hqd", p.astype(bf16), v.astype(bf16),
                         preferred_element_type=f32)                      # [nH, S, dH]
        ctx = jnp.concatenate([ctx[h_] for h_ in range(nH)], axis=-1)     # [S, H]

        # out-projection + residual + LayerNorm (all in vregs/VMEM)
        y = (jnp.dot(ctx.astype(bf16), wo_ref[l], preferred_element_type=f32)
             + bo_ref[l] + hs)
        hs1 = _layernorm(y, ln1g_ref[l], ln1b_ref[l], eps)

        # FFN (w1 + GELU + w2) + residual + LayerNorm
        hi = (jnp.dot(hs1.astype(bf16), w1_ref[l], preferred_element_type=f32)
              + b1_ref[l])
        # TODO(synk): HF BERT's default 'gelu' is erf-based; tanh approximation used here.
        hi = jax.nn.gelu(hi, approximate=True)
        y2 = (jnp.dot(hi.astype(bf16), w2_ref[l], preferred_element_type=f32)
              + b2_ref[l] + hs1)
        hs = _layernorm(y2, ln2g_ref[l], ln2b_ref[l], eps)

    # ---- 4) LSTM decoder (batch_first, gate order i,f,g,o) ----
    # input projection hoisted out of the recurrence: one [S,H]@[H,4U] matmul
    gx = (jnp.dot(hs.astype(bf16), wih_ref[...], preferred_element_type=f32)
          + lb_ref[...])                                                  # [S, 4U]
    h_t = jnp.zeros((1, U), f32)
    c_t = jnp.zeros((1, U), f32)
    outs = []
    for t in range(S):                                                    # static S
        # single fused-gate dot per step: [1,U] @ [U,4U]
        z = gx[t:t + 1, :] + jnp.dot(h_t.astype(bf16), whh_ref[...],
                                     preferred_element_type=f32)          # [1, 4U]
        i_g = jax.nn.sigmoid(z[:, 0 * U:1 * U])
        f_g = jax.nn.sigmoid(z[:, 1 * U:2 * U])
        g_g = jnp.tanh(z[:, 2 * U:3 * U])
        o_g = jax.nn.sigmoid(z[:, 3 * U:4 * U])
        c_t = f_g * c_t + i_g * g_g
        h_t = o_g * jnp.tanh(c_t)
        outs.append(h_t)
    dec = jnp.concatenate(outs, axis=-1)                                  # [1, S*U]

    # ---- 5) output projection: [1, S*U] @ [S*U, E] -> [1, E] ----
    out = jnp.dot(dec.astype(bf16), ow_ref[...], preferred_element_type=f32) + ob_ref[...]
    o_ref[0] = out.astype(o_ref.dtype)


def bert_autoencoder_forward(params, x, cfg):
    B, E = x.shape
    S, H, nH, U, I, L = (cfg[k] for k in ("S", "H", "nH", "U", "I", "L"))
    assert cfg["E"] == E
    dH = H // nH

    inputs = [
        x.reshape(B, 1, E).astype(jnp.float32),
        params["adapter_w"], params["adapter_b"],
        params["pos_emb"], params["tok_emb0"],
        params["emb_ln_g"], params["emb_ln_b"],
        params["w_qkv"], params["b_qkv"],
        params["wo"], params["bo"],
        params["ln1_g"], params["ln1_b"],
        params["w1"], params["b1"],
        params["w2"], params["b2"],
        params["ln2_g"], params["ln2_b"],
        params["lstm_w_ih"], params["lstm_w_hh"], params["lstm_b"],
        params["out_w"], params["out_b"],
    ]

    # Everything except x/out is block-constant across the batch grid: the index
    # map never changes, so Pallas keeps the block resident (DMA'd once).
    def _const_spec(arr):
        rank = arr.ndim
        return pl.BlockSpec(arr.shape, lambda b, _r=rank: (0,) * _r)

    in_specs = [pl.BlockSpec((1, 1, E), lambda b: (b, 0, 0))]
    in_specs += [_const_spec(a) for a in inputs[1:]]

    # VMEM guard: fully weight-resident design.  ~100 KB at this config — fits
    # v5e/v6e (128 MiB) and v7x (64 MiB) with huge margin.
    # TODO(synk): add a tiled multi-kernel fallback if weights outgrow VMEM.
    weight_bytes = sum(int(a.size) * a.dtype.itemsize for a in inputs[1:])
    assert weight_bytes < 16 * 1024 * 1024, weight_bytes

    flops_per_row = (
        2 * E * S * H                                        # adapter
        + L * (2 * S * 3 * H * H                             # qkv proj
               + 2 * 2 * nH * S * S * dH                     # scores + context
               + 2 * S * H * H                               # out proj
               + 2 * S * H * I + 2 * S * I * H)              # FFN
        + 2 * S * H * 4 * U + S * 2 * U * 4 * U              # LSTM in-proj + recurrence
        + 2 * S * U * E)                                      # output proj
    trans_per_row = L * (nH * S * S + S * I) + S * 5 * U
    cost = pl.CostEstimate(
        flops=B * flops_per_row,
        transcendentals=B * trans_per_row,
        bytes_accessed=weight_bytes + 2 * B * E * 4)

    kern = functools.partial(_fused_forward_kernel,
                             S=S, H=H, nH=nH, U=U, L=L, eps=_LN_EPS)
    out = pl.pallas_call(
        kern,
        out_shape=jax.ShapeDtypeStruct((B, 1, E), jnp.float32),
        grid=(B,),
        in_specs=in_specs,
        out_specs=pl.BlockSpec((1, 1, E), lambda b: (b, 0, 0)),
        compiler_params=pltpu.CompilerParams(
            dimension_semantics=("parallel",)),   # megacore: one batch row per TC
        cost_estimate=cost,
    )(*inputs)
    return out.reshape(B, E)


# --------------------------- parameter construction --------------------------


def init_params(key, cfg):
    E, H, S, U, nH, I, L = (cfg[k] for k in ("E", "H", "S", "U", "nH", "I", "L"))
    keys = iter(jax.random.split(key, 24))

    def wmat(shape, scale=0.02):
        # matmul weights stored bf16 (MXU-native); everything else fp32
        return (scale * jax.random.normal(next(keys), shape, jnp.float32)).astype(jnp.bfloat16)

    def vec(shape, scale=0.02):
        return scale * jax.random.normal(next(keys), shape, jnp.float32)

    return {
        "adapter_w": wmat((E, S * H)),
        "adapter_b": vec((1, S * H)),
        "pos_emb": vec((S, H)),
        "tok_emb0": vec((1, H)),
        "emb_ln_g": jnp.ones((1, H), jnp.float32),
        "emb_ln_b": jnp.zeros((1, H), jnp.float32),
        # q|k|v projections fused into a single [H, 3H] weight per layer
        "w_qkv": wmat((L, H, 3 * H)),
        "b_qkv": vec((L, 1, 3 * H)),
        "wo": wmat((L, H, H)),
        "bo": vec((L, 1, H)),
        "ln1_g": jnp.ones((L, 1, H), jnp.float32),
        "ln1_b": jnp.zeros((L, 1, H), jnp.float32),
        "w1": wmat((L, H, I)),
        "b1": vec((L, 1, I)),
        "w2": wmat((L, I, H)),
        "b2": vec((L, 1, H)),
        "ln2_g": jnp.ones((L, 1, H), jnp.float32),
        "ln2_b": jnp.zeros((L, 1, H), jnp.float32),
        "lstm_w_ih": wmat((H, 4 * U), 0.1),
        "lstm_w_hh": wmat((U, 4 * U), 0.1),
        # PyTorch keeps b_ih and b_hh separately but only their sum is applied.
        "lstm_b": vec((1, 4 * U), 0.1),
        "out_w": wmat((S * U, E)),
        "out_b": vec((1, E)),
    }


# ------------------------------------ main ------------------------------------

if __name__ == "__main__":
    # Small synthetic configuration consistent with the module's forward:
    # embedding_dim=64, hidden_dim=32, lstm_units=16, sequence_length=4,
    # 2 BERT layers, 2 attention heads, intermediate 64, batch 2.
    cfg = dict(E=64, H=32, S=4, U=16, nH=2, I=64, L=2)

    key = jax.random.PRNGKey(0)
    pkey, xkey = jax.random.split(key)
    params = init_params(pkey, cfg)
    x = jax.random.normal(xkey, (2, cfg["E"]), jnp.float32)

    fwd = jax.jit(lambda p, xx: bert_autoencoder_forward(p, xx, cfg))
    out = jax.block_until_ready(fwd(params, x))

    assert out.shape == (2, cfg["E"]), out.shape
    assert bool(jnp.all(jnp.isfinite(out)))
    print("KERNEL_OK")
</pallas_src>

<mosaic_0001>
module attributes {stable_mosaic.version = 11 : i64} {
  func.func @_fused_forward_kernel(%arg0: i32, %arg1: memref<1x1x64xf32, #tpu.memory_space<vmem>>, %arg2: memref<64x128xbf16, #tpu.memory_space<vmem>>, %arg3: memref<1x128xf32, #tpu.memory_space<vmem>>, %arg4: memref<4x32xf32, #tpu.memory_space<vmem>>, %arg5: memref<1x32xf32, #tpu.memory_space<vmem>>, %arg6: memref<1x32xf32, #tpu.memory_space<vmem>>, %arg7: memref<1x32xf32, #tpu.memory_space<vmem>>, %arg8: memref<2x32x96xbf16, #tpu.memory_space<vmem>>, %arg9: memref<2x1x96xf32, #tpu.memory_space<vmem>>, %arg10: memref<2x32x32xbf16, #tpu.memory_space<vmem>>, %arg11: memref<2x1x32xf32, #tpu.memory_space<vmem>>, %arg12: memref<2x1x32xf32, #tpu.memory_space<vmem>>, %arg13: memref<2x1x32xf32, #tpu.memory_space<vmem>>, %arg14: memref<2x32x64xbf16, #tpu.memory_space<vmem>>, %arg15: memref<2x1x64xf32, #tpu.memory_space<vmem>>, %arg16: memref<2x64x32xbf16, #tpu.memory_space<vmem>>, %arg17: memref<2x1x32xf32, #tpu.memory_space<vmem>>, %arg18: memref<2x1x32xf32, #tpu.memory_space<vmem>>, %arg19: memref<2x1x32xf32, #tpu.memory_space<vmem>>, %arg20: memref<32x64xbf16, #tpu.memory_space<vmem>>, %arg21: memref<16x64xbf16, #tpu.memory_space<vmem>>, %arg22: memref<1x64xf32, #tpu.memory_space<vmem>>, %arg23: memref<64x64xbf16, #tpu.memory_space<vmem>>, %arg24: memref<1x64xf32, #tpu.memory_space<vmem>>, %arg25: memref<1x1x64xf32, #tpu.memory_space<vmem>>) attributes {dimension_semantics = [#tpu.dimension_semantics<parallel>], iteration_bounds = array<i64: 2>, scalar_prefetch = 0 : i64, scratch_operands = 0 : i64, tpu.core_type = #tpu.core_type<tc>, window_params = [{transform_indices = @transform_0, window_bounds = array<i64: 1, 1, 64>}, {pipeline_mode = #tpu.pipeline_mode<synchronous>, transform_indices = @transform_1, window_bounds = array<i64: 64, 128>}, {pipeline_mode = #tpu.pipeline_mode<synchronous>, transform_indices = @transform_2, window_bounds = array<i64: 1, 128>}, {pipeline_mode = #tpu.pipeline_mode<synchronous>, transform_indices = @transform_3, window_bounds = array<i64: 4, 32>}, {pipeline_mode = #tpu.pipeline_mode<synchronous>, transform_indices = @transform_4, window_bounds = array<i64: 1, 32>}, {pipeline_mode = #tpu.pipeline_mode<synchronous>, transform_indices = @transform_5, window_bounds = array<i64: 1, 32>}, {pipeline_mode = #tpu.pipeline_mode<synchronous>, transform_indices = @transform_6, window_bounds = array<i64: 1, 32>}, {pipeline_mode = #tpu.pipeline_mode<synchronous>, transform_indices = @transform_7, window_bounds = array<i64: 2, 32, 96>}, {pipeline_mode = #tpu.pipeline_mode<synchronous>, transform_indices = @transform_8, window_bounds = array<i64: 2, 1, 96>}, {pipeline_mode = #tpu.pipeline_mode<synchronous>, transform_indices = @transform_9, window_bounds = array<i64: 2, 32, 32>}, {pipeline_mode = #tpu.pipeline_mode<synchronous>, transform_indices = @transform_10, window_bounds = array<i64: 2, 1, 32>}, {pipeline_mode = #tpu.pipeline_mode<synchronous>, transform_indices = @transform_11, window_bounds = array<i64: 2, 1, 32>}, {pipeline_mode = #tpu.pipeline_mode<synchronous>, transform_indices = @transform_12, window_bounds = array<i64: 2, 1, 32>}, {pipeline_mode = #tpu.pipeline_mode<synchronous>, transform_indices = @transform_13, window_bounds = array<i64: 2, 32, 64>}, {pipeline_mode = #tpu.pipeline_mode<synchronous>, transform_indices = @transform_14, window_bounds = array<i64: 2, 1, 64>}, {pipeline_mode = #tpu.pipeline_mode<synchronous>, transform_indices = @transform_15, window_bounds = array<i64: 2, 64, 32>}, {pipeline_mode = #tpu.pipeline_mode<synchronous>, transform_indices = @transform_16, window_bounds = array<i64: 2, 1, 32>}, {pipeline_mode = #tpu.pipeline_mode<synchronous>, transform_indices = @transform_17, window_bounds = array<i64: 2, 1, 32>}, {pipeline_mode = #tpu.pipeline_mode<synchronous>, transform_indices = @transform_18, window_bounds = array<i64: 2, 1, 32>}, {pipeline_mode = #tpu.pipeline_mode<synchronous>, transform_indices = @transform_19, window_bounds = array<i64: 32, 64>}, {pipeline_mode = #tpu.pipeline_mode<synchronous>, transform_indices = @transform_20, window_bounds = array<i64: 16, 64>}, {pipeline_mode = #tpu.pipeline_mode<synchronous>, transform_indices = @transform_21, window_bounds = array<i64: 1, 64>}, {pipeline_mode = #tpu.pipeline_mode<synchronous>, transform_indices = @transform_22, window_bounds = array<i64: 64, 64>}, {pipeline_mode = #tpu.pipeline_mode<synchronous>, transform_indices = @transform_23, window_bounds = array<i64: 1, 64>}, {transform_indices = @transform_24, window_bounds = array<i64: 1, 1, 64>}]} {
    %c0 = arith.constant 0 : index
    %c0_0 = arith.constant 0 : index
    %c0_1 = arith.constant 0 : index
    %0 = vector.load %arg1[%c0, %c0_0, %c0_1] : memref<1x1x64xf32, #tpu.memory_space<vmem>>, vector<1x1x64xf32>
    %1 = vector.shape_cast %0 : vector<1x1x64xf32> to vector<1x64xf32>
    %2 = arith.truncf %1 : vector<1x64xf32> to vector<1x64xbf16>
    %c0_2 = arith.constant 0 : index
    %c0_3 = arith.constant 0 : index
    %3 = vector.load %arg2[%c0_2, %c0_3] : memref<64x128xbf16, #tpu.memory_space<vmem>>, vector<64x128xbf16>
    %cst = arith.constant dense<0.000000e+00> : vector<1x128xf32>
    %4 = tpu.matmul %2, %3, %cst {dimension_numbers = #tpu.dot_dimension_numbers<[1], [0], [0], [1], [0, 0, 1, 1], [], []>} : vector<1x64xbf16>, vector<64x128xbf16>, vector<1x128xf32> -> vector<1x128xf32>
    %c0_4 = arith.constant 0 : index
    %c0_5 = arith.constant 0 : index
    %5 = vector.load %arg3[%c0_4, %c0_5] : memref<1x128xf32, #tpu.memory_space<vmem>>, vector<1x128xf32>
    %6 = arith.addf %4, %5 : vector<1x128xf32>
    %7 = vector.extract_strided_slice %6 {offsets = [0, 0], sizes = [1, 32], strides = [1, 1]} : vector<1x128xf32> to vector<1x32xf32>
    %8 = vector.extract_strided_slice %6 {offsets = [0, 32], sizes = [1, 32], strides = [1, 1]} : vector<1x128xf32> to vector<1x32xf32>
    %9 = vector.extract_strided_slice %6 {offsets = [0, 64], sizes = [1, 32], strides = [1, 1]} : vector<1x128xf32> to vector<1x32xf32>
    %10 = vector.extract_strided_slice %6 {offsets = [0, 96], sizes = [1, 32], strides = [1, 1]} : vector<1x128xf32> to vector<1x32xf32>
    %11 = tpu.concatenate %7, %8, %9, %10 in 0 : vector<1x32xf32>, vector<1x32xf32>, vector<1x32xf32>, vector<1x32xf32> -> vector<4x32xf32>
    %c0_6 = arith.constant 0 : index
    %c0_7 = arith.constant 0 : index
    %12 = vector.load %arg4[%c0_6, %c0_7] : memref<4x32xf32, #tpu.memory_space<vmem>>, vector<4x32xf32>
    %13 = arith.addf %11, %12 : vector<4x32xf32>
    %c0_8 = arith.constant 0 : index
    %c0_9 = arith.constant 0 : index
    %14 = vector.load %arg5[%c0_8, %c0_9] : memref<1x32xf32, #tpu.memory_space<vmem>>, vector<1x32xf32>
    %15 = vector.broadcast %14 : vector<1x32xf32> to vector<4x32xf32>
    %16 = arith.addf %13, %15 : vector<4x32xf32>
    %c0_10 = arith.constant 0 : index
    %c0_11 = arith.constant 0 : index
    %17 = vector.load %arg6[%c0_10, %c0_11] : memref<1x32xf32, #tpu.memory_space<vmem>>, vector<1x32xf32>
    %c0_12 = arith.constant 0 : index
    %c0_13 = arith.constant 0 : index
    %18 = vector.load %arg7[%c0_12, %c0_13] : memref<1x32xf32, #tpu.memory_space<vmem>>, vector<1x32xf32>
    %cst_14 = arith.constant dense<0.000000e+00> : vector<4xf32>
    %19 = vector.multi_reduction <add>, %16, %cst_14 [1] : vector<4x32xf32> to vector<4xf32>
    %20 = vector.shape_cast %19 : vector<4xf32> to vector<4x1xf32>
    %cst_15 = arith.constant 3.200000e+01 : f32
    %21 = vector.broadcast %cst_15 : f32 to vector<4x1xf32>
    %22 = arith.divf %20, %21 : vector<4x1xf32>
    %23 = vector.broadcast %22 : vector<4x1xf32> to vector<4x32xf32>
    %24 = arith.subf %16, %23 : vector<4x32xf32>
    %25 = arith.mulf %24, %24 : vector<4x32xf32>
    %cst_16 = arith.constant dense<0.000000e+00> : vector<4xf32>
    %26 = vector.multi_reduction <add>, %25, %cst_16 [1] : vector<4x32xf32> to vector<4xf32>
    %27 = vector.shape_cast %26 : vector<4xf32> to vector<4x1xf32>
    %cst_17 = arith.constant 3.200000e+01 : f32
    %28 = vector.broadcast %cst_17 : f32 to vector<4x1xf32>
    %29 = arith.divf %27, %28 : vector<4x1xf32>
    %cst_18 = arith.constant 9.99999996E-13 : f32
    %30 = vector.broadcast %cst_18 : f32 to vector<4x1xf32>
    %31 = arith.addf %29, %30 : vector<4x1xf32>
    %32 = math.rsqrt %31 : vector<4x1xf32>
    %33 = vector.broadcast %32 : vector<4x1xf32> to vector<4x32xf32>
    %34 = arith.mulf %24, %33 : vector<4x32xf32>
    %35 = vector.broadcast %17 : vector<1x32xf32> to vector<4x32xf32>
    %36 = arith.mulf %34, %35 : vector<4x32xf32>
    %37 = vector.broadcast %18 : vector<1x32xf32> to vector<4x32xf32>
    %38 = arith.addf %36, %37 : vector<4x32xf32>
    %39 = arith.truncf %38 : vector<4x32xf32> to vector<4x32xbf16>
    %c0_19 = arith.constant 0 : index
    %c0_20 = arith.constant 0 : index
    %c0_21 = arith.constant 0 : index
    %40 = vector.load %arg8[%c0_19, %c0_20, %c0_21] : memref<2x32x96xbf16, #tpu.memory_space<vmem>>, vector<1x32x96xbf16>
    %41 = vector.shape_cast %40 : vector<1x32x96xbf16> to vector<32x96xbf16>
    %cst_22 = arith.constant dense<0.000000e+00> : vector<4x96xf32>
    %42 = tpu.matmul %39, %41, %cst_22 {dimension_numbers = #tpu.dot_dimension_numbers<[1], [0], [0], [1], [0, 0, 1, 1], [], []>} : vector<4x32xbf16>, vector<32x96xbf16>, vector<4x96xf32> -> vector<4x96xf32>
    %c0_23 = arith.constant 0 : index
    %c0_24 = arith.constant 0 : index
    %c0_25 = arith.constant 0 : index
    %43 = vector.load %arg9[%c0_23, %c0_24, %c0_25] : memref<2x1x96xf32, #tpu.memory_space<vmem>>, vector<1x1x96xf32>
    %44 = vector.shape_cast %43 : vector<1x1x96xf32> to vector<1x96xf32>
    %45 = vector.broadcast %44 : vector<1x96xf32> to vector<4x96xf32>
    %46 = arith.addf %42, %45 : vector<4x96xf32>
    %47 = vector.extract_strided_slice %46 {offsets = [0, 0], sizes = [4, 16], strides = [1, 1]} : vector<4x96xf32> to vector<4x16xf32>
    %48 = vector.extract_strided_slice %46 {offsets = [0, 16], sizes = [4, 16], strides = [1, 1]} : vector<4x96xf32> to vector<4x16xf32>
    %49 = vector.shape_cast %47 : vector<4x16xf32> to vector<1x4x16xf32>
    %50 = vector.shape_cast %48 : vector<4x16xf32> to vector<1x4x16xf32>
    %51 = tpu.concatenate %49, %50 in 0 : vector<1x4x16xf32>, vector<1x4x16xf32> -> vector<2x4x16xf32>
    %52 = vector.extract_strided_slice %46 {offsets = [0, 32], sizes = [4, 16], strides = [1, 1]} : vector<4x96xf32> to vector<4x16xf32>
    %53 = vector.extract_strided_slice %46 {offsets = [0, 48], sizes = [4, 16], strides = [1, 1]} : vector<4x96xf32> to vector<4x16xf32>
    %54 = vector.shape_cast %52 : vector<4x16xf32> to vector<1x4x16xf32>
    %55 = vector.shape_cast %53 : vector<4x16xf32> to vector<1x4x16xf32>
    %56 = tpu.concatenate %54, %55 in 0 : vector<1x4x16xf32>, vector<1x4x16xf32> -> vector<2x4x16xf32>
    %57 = vector.extract_strided_slice %46 {offsets = [0, 64], sizes = [4, 16], strides = [1, 1]} : vector<4x96xf32> to vector<4x16xf32>
    %58 = vector.extract_strided_slice %46 {offsets = [0, 80], sizes = [4, 16], strides = [1, 1]} : vector<4x96xf32> to vector<4x16xf32>
    %59 = vector.shape_cast %57 : vector<4x16xf32> to vector<1x4x16xf32>
    %60 = vector.shape_cast %58 : vector<4x16xf32> to vector<1x4x16xf32>
    %61 = tpu.concatenate %59, %60 in 0 : vector<1x4x16xf32>, vector<1x4x16xf32> -> vector<2x4x16xf32>
    %62 = arith.truncf %51 : vector<2x4x16xf32> to vector<2x4x16xbf16>
    %63 = arith.truncf %56 : vector<2x4x16xf32> to vector<2x4x16xbf16>
    "tpu.trace_start"() <{level = 10 : i32, message = "hqd,hkd->hqk"}> : () -> ()
    %cst_26 = arith.constant dense<0.000000e+00> : vector<2x4x4xf32>
    %64 = tpu.matmul %62, %63, %cst_26 {dimension_numbers = #tpu.dot_dimension_numbers<[2], [2], [1], [1], [0, 0, 0, 1, 1, 1], [0], [0]>} : vector<2x4x16xbf16>, vector<2x4x16xbf16>, vector<2x4x4xf32> -> vector<2x4x4xf32>
    "tpu.trace_stop"() : () -> ()
    %cst_27 = arith.constant 2.500000e-01 : f32
    %65 = vector.broadcast %cst_27 : f32 to vector<2x4x4xf32>
    %66 = arith.mulf %64, %65 : vector<2x4x4xf32>
    %cst_28 = arith.constant dense<0xFF800000> : vector<2x4xf32>
    %67 = vector.multi_reduction <maximumf>, %66, %cst_28 [2] : vector<2x4x4xf32> to vector<2x4xf32>
    %68 = vector.shape_cast %67 : vector<2x4xf32> to vector<2x4x1xf32>
    %69 = vector.broadcast %68 : vector<2x4x1xf32> to vector<2x4x4xf32>
    %70 = arith.subf %66, %69 : vector<2x4x4xf32>
    %71 = math.exp %70 : vector<2x4x4xf32>
    %cst_29 = arith.constant dense<0.000000e+00> : vector<2x4xf32>
    %72 = vector.multi_reduction <add>, %71, %cst_29 [2] : vector<2x4x4xf32> to vector<2x4xf32>
    %73 = vector.shape_cast %72 : vector<2x4xf32> to vector<2x4x1xf32>
    %74 = tpu.reciprocal %73 {approx = true} : vector<2x4x1xf32> -> vector<2x4x1xf32>
    %75 = vector.broadcast %74 : vector<2x4x1xf32> to vector<2x4x4xf32>
    %76 = arith.mulf %71, %75 : vector<2x4x4xf32>
    %77 = arith.truncf %76 : vector<2x4x4xf32> to vector<2x4x4xbf16>
    %78 = arith.truncf %61 : vector<2x4x16xf32> to vector<2x4x16xbf16>
    "tpu.trace_start"() <{level = 10 : i32, message = "hqk,hkd->hqd"}> : () -> ()
    %cst_30 = arith.constant dense<0.000000e+00> : vector<2x4x16xf32>
    %79 = tpu.matmul %77, %78, %cst_30 {dimension_numbers = #tpu.dot_dimension_numbers<[2], [1], [1], [2], [0, 0, 0, 1, 1, 2], [0], [0]>} : vector<2x4x4xbf16>, vector<2x4x16xbf16>, vector<2x4x16xf32> -> vector<2x4x16xf32>
    "tpu.trace_stop"() : () -> ()
    %80 = vector.extract_strided_slice %79 {offsets = [0, 0, 0], sizes = [1, 4, 16], strides = [1, 1, 1]} : vector<2x4x16xf32> to vector<1x4x16xf32>
    %81 = vector.shape_cast %80 : vector<1x4x16xf32> to vector<4x16xf32>
    %82 = vector.extract_strided_slice %79 {offsets = [1, 0, 0], sizes = [1, 4, 16], strides = [1, 1, 1]} : vector<2x4x16xf32> to vector<1x4x16xf32>
    %83 = vector.shape_cast %82 : vector<1x4x16xf32> to vector<4x16xf32>
    %84 = tpu.concatenate %81, %83 in 1 : vector<4x16xf32>, vector<4x16xf32> -> vector<4x32xf32>
    %85 = arith.truncf %84 : vector<4x32xf32> to vector<4x32xbf16>
    %c0_31 = arith.constant 0 : index
    %c0_32 = arith.constant 0 : index
    %c0_33 = arith.constant 0 : index
    %86 = vector.load %arg10[%c0_31, %c0_32, %c0_33] : memref<2x32x32xbf16, #tpu.memory_space<vmem>>, vector<1x32x32xbf16>
    %87 = vector.shape_cast %86 : vector<1x32x32xbf16> to vector<32x32xbf16>
    %cst_34 = arith.constant dense<0.000000e+00> : vector<4x32xf32>
    %88 = tpu.matmul %85, %87, %cst_34 {dimension_numbers = #tpu.dot_dimension_numbers<[1], [0], [0], [1], [0, 0, 1, 1], [], []>} : vector<4x32xbf16>, vector<32x32xbf16>, vector<4x32xf32> -> vector<4x32xf32>
    %c0_35 = arith.constant 0 : index
    %c0_36 = arith.constant 0 : index
    %c0_37 = arith.constant 0 : index
    %89 = vector.load %arg11[%c0_35, %c0_36, %c0_37] : memref<2x1x32xf32, #tpu.memory_space<vmem>>, vector<1x1x32xf32>
    %90 = vector.shape_cast %89 : vector<1x1x32xf32> to vector<1x32xf32>
    %91 = vector.broadcast %90 : vector<1x32xf32> to vector<4x32xf32>
    %92 = arith.addf %88, %91 : vector<4x32xf32>
    %93 = arith.addf %92, %38 : vector<4x32xf32>
    %c0_38 = arith.constant 0 : index
    %c0_39 = arith.constant 0 : index
    %c0_40 = arith.constant 0 : index
    %94 = vector.load %arg12[%c0_38, %c0_39, %c0_40] : memref<2x1x32xf32, #tpu.memory_space<vmem>>, vector<1x1x32xf32>
    %95 = vector.shape_cast %94 : vector<1x1x32xf32> to vector<1x32xf32>
    %c0_41 = arith.constant 0 : index
    %c0_42 = arith.constant 0 : index
    %c0_43 = arith.constant 0 : index
    %96 = vector.load %arg13[%c0_41, %c0_42, %c0_43] : memref<2x1x32xf32, #tpu.memory_space<vmem>>, vector<1x1x32xf32>
    %97 = vector.shape_cast %96 : vector<1x1x32xf32> to vector<1x32xf32>
    %cst_44 = arith.constant dense<0.000000e+00> : vector<4xf32>
    %98 = vector.multi_reduction <add>, %93, %cst_44 [1] : vector<4x32xf32> to vector<4xf32>
    %99 = vector.shape_cast %98 : vector<4xf32> to vector<4x1xf32>
    %cst_45 = arith.constant 3.200000e+01 : f32
    %100 = vector.broadcast %cst_45 : f32 to vector<4x1xf32>
    %101 = arith.divf %99, %100 : vector<4x1xf32>
    %102 = vector.broadcast %101 : vector<4x1xf32> to vector<4x32xf32>
    %103 = arith.subf %93, %102 : vector<4x32xf32>
    %104 = arith.mulf %103, %103 : vector<4x32xf32>
    %cst_46 = arith.constant dense<0.000000e+00> : vector<4xf32>
    %105 = vector.multi_reduction <add>, %104, %cst_46 [1] : vector<4x32xf32> to vector<4xf32>
    %106 = vector.shape_cast %105 : vector<4xf32> to vector<4x1xf32>
    %cst_47 = arith.constant 3.200000e+01 : f32
    %107 = vector.broadcast %cst_47 : f32 to vector<4x1xf32>
    %108 = arith.divf %106, %107 : vector<4x1xf32>
    %cst_48 = arith.constant 9.99999996E-13 : f32
    %109 = vector.broadcast %cst_48 : f32 to vector<4x1xf32>
    %110 = arith.addf %108, %109 : vector<4x1xf32>
    %111 = math.rsqrt %110 : vector<4x1xf32>
    %112 = vector.broadcast %111 : vector<4x1xf32> to vector<4x32xf32>
    %113 = arith.mulf %103, %112 : vector<4x32xf32>
    %114 = vector.broadcast %95 : vector<1x32xf32> to vector<4x32xf32>
    %115 = arith.mulf %113, %114 : vector<4x32xf32>
    %116 = vector.broadcast %97 : vector<1x32xf32> to vector<4x32xf32>
    %117 = arith.addf %115, %116 : vector<4x32xf32>
    %118 = arith.truncf %117 : vector<4x32xf32> to vector<4x32xbf16>
    %c0_49 = arith.constant 0 : index
    %c0_50 = arith.constant 0 : index
    %c0_51 = arith.constant 0 : index
    %119 = vector.load %arg14[%c0_49, %c0_50, %c0_51] : memref<2x32x64xbf16, #tpu.memory_space<vmem>>, vector<1x32x64xbf16>
    %120 = vector.shape_cast %119 : vector<1x32x64xbf16> to vector<32x64xbf16>
    %cst_52 = arith.constant dense<0.000000e+00> : vector<4x64xf32>
    %121 = tpu.matmul %118, %120, %cst_52 {dimension_numbers = #tpu.dot_dimension_numbers<[1], [0], [0], [1], [0, 0, 1, 1], [], []>} : vector<4x32xbf16>, vector<32x64xbf16>, vector<4x64xf32> -> vector<4x64xf32>
    %c0_53 = arith.constant 0 : index
    %c0_54 = arith.constant 0 : index
    %c0_55 = arith.constant 0 : index
    %122 = vector.load %arg15[%c0_53, %c0_54, %c0_55] : memref<2x1x64xf32, #tpu.memory_space<vmem>>, vector<1x1x64xf32>
    %123 = vector.shape_cast %122 : vector<1x1x64xf32> to vector<1x64xf32>
    %124 = vector.broadcast %123 : vector<1x64xf32> to vector<4x64xf32>
    %125 = arith.addf %121, %124 : vector<4x64xf32>
    %126 = arith.mulf %125, %125 : vector<4x64xf32>
    %127 = arith.mulf %125, %126 : vector<4x64xf32>
    %cst_56 = arith.constant 4.471500e-02 : f32
    %128 = vector.broadcast %cst_56 : f32 to vector<4x64xf32>
    %129 = arith.mulf %128, %127 : vector<4x64xf32>
    %130 = arith.addf %125, %129 : vector<4x64xf32>
    %cst_57 = arith.constant 0.797884583 : f32
    %131 = vector.broadcast %cst_57 : f32 to vector<4x64xf32>
    %132 = arith.mulf %131, %130 : vector<4x64xf32>
    %133 = math.tanh %132 : vector<4x64xf32>
    %cst_58 = arith.constant 1.000000e+00 : f32
    %134 = vector.broadcast %cst_58 : f32 to vector<4x64xf32>
    %135 = arith.addf %134, %133 : vector<4x64xf32>
    %cst_59 = arith.constant 5.000000e-01 : f32
    %136 = vector.broadcast %cst_59 : f32 to vector<4x64xf32>
    %137 = arith.mulf %136, %135 : vector<4x64xf32>
    %138 = arith.mulf %125, %137 : vector<4x64xf32>
    %139 = arith.truncf %138 : vector<4x64xf32> to vector<4x64xbf16>
    %c0_60 = arith.constant 0 : index
    %c0_61 = arith.constant 0 : index
    %c0_62 = arith.constant 0 : index
    %140 = vector.load %arg16[%c0_60, %c0_61, %c0_62] : memref<2x64x32xbf16, #tpu.memory_space<vmem>>, vector<1x64x32xbf16>
    %141 = vector.shape_cast %140 : vector<1x64x32xbf16> to vector<64x32xbf16>
    %cst_63 = arith.constant dense<0.000000e+00> : vector<4x32xf32>
    %142 = tpu.matmul %139, %141, %cst_63 {dimension_numbers = #tpu.dot_dimension_numbers<[1], [0], [0], [1], [0, 0, 1, 1], [], []>} : vector<4x64xbf16>, vector<64x32xbf16>, vector<4x32xf32> -> vector<4x32xf32>
    %c0_64 = arith.constant 0 : index
    %c0_65 = arith.constant 0 : index
    %c0_66 = arith.constant 0 : index
    %143 = vector.load %arg17[%c0_64, %c0_65, %c0_66] : memref<2x1x32xf32, #tpu.memory_space<vmem>>, vector<1x1x32xf32>
    %144 = vector.shape_cast %143 : vector<1x1x32xf32> to vector<1x32xf32>
    %145 = vector.broadcast %144 : vector<1x32xf32> to vector<4x32xf32>
    %146 = arith.addf %142, %145 : vector<4x32xf32>
    %147 = arith.addf %146, %117 : vector<4x32xf32>
    %c0_67 = arith.constant 0 : index
    %c0_68 = arith.constant 0 : index
    %c0_69 = arith.constant 0 : index
    %148 = vector.load %arg18[%c0_67, %c0_68, %c0_69] : memref<2x1x32xf32, #tpu.memory_space<vmem>>, vector<1x1x32xf32>
    %149 = vector.shape_cast %148 : vector<1x1x32xf32> to vector<1x32xf32>
    %c0_70 = arith.constant 0 : index
    %c0_71 = arith.constant 0 : index
    %c0_72 = arith.constant 0 : index
    %150 = vector.load %arg19[%c0_70, %c0_71, %c0_72] : memref<2x1x32xf32, #tpu.memory_space<vmem>>, vector<1x1x32xf32>
    %151 = vector.shape_cast %150 : vector<1x1x32xf32> to vector<1x32xf32>
    %cst_73 = arith.constant dense<0.000000e+00> : vector<4xf32>
    %152 = vector.multi_reduction <add>, %147, %cst_73 [1] : vector<4x32xf32> to vector<4xf32>
    %153 = vector.shape_cast %152 : vector<4xf32> to vector<4x1xf32>
    %cst_74 = arith.constant 3.200000e+01 : f32
    %154 = vector.broadcast %cst_74 : f32 to vector<4x1xf32>
    %155 = arith.divf %153, %154 : vector<4x1xf32>
    %156 = vector.broadcast %155 : vector<4x1xf32> to vector<4x32xf32>
    %157 = arith.subf %147, %156 : vector<4x32xf32>
    %158 = arith.mulf %157, %157 : vector<4x32xf32>
    %cst_75 = arith.constant dense<0.000000e+00> : vector<4xf32>
    %159 = vector.multi_reduction <add>, %158, %cst_75 [1] : vector<4x32xf32> to vector<4xf32>
    %160 = vector.shape_cast %159 : vector<4xf32> to vector<4x1xf32>
    %cst_76 = arith.constant 3.200000e+01 : f32
    %161 = vector.broadcast %cst_76 : f32 to vector<4x1xf32>
    %162 = arith.divf %160, %161 : vector<4x1xf32>
    %cst_77 = arith.constant 9.99999996E-13 : f32
    %163 = vector.broadcast %cst_77 : f32 to vector<4x1xf32>
    %164 = arith.addf %162, %163 : vector<4x1xf32>
    %165 = math.rsqrt %164 : vector<4x1xf32>
    %166 = vector.broadcast %165 : vector<4x1xf32> to vector<4x32xf32>
    %167 = arith.mulf %157, %166 : vector<4x32xf32>
    %168 = vector.broadcast %149 : vector<1x32xf32> to vector<4x32xf32>
    %169 = arith.mulf %167, %168 : vector<4x32xf32>
    %170 = vector.broadcast %151 : vector<1x32xf32> to vector<4x32xf32>
    %171 = arith.addf %169, %170 : vector<4x32xf32>
    %172 = arith.truncf %171 : vector<4x32xf32> to vector<4x32xbf16>
    %c1 = arith.constant 1 : index
    %c0_78 = arith.constant 0 : index
    %c0_79 = arith.constant 0 : index
    %173 = vector.load %arg8[%c1, %c0_78, %c0_79] : memref<2x32x96xbf16, #tpu.memory_space<vmem>>, vector<1x32x96xbf16>
    %174 = vector.shape_cast %173 : vector<1x32x96xbf16> to vector<32x96xbf16>
    %cst_80 = arith.constant dense<0.000000e+00> : vector<4x96xf32>
    %175 = tpu.matmul %172, %174, %cst_80 {dimension_numbers = #tpu.dot_dimension_numbers<[1], [0], [0], [1], [0, 0, 1, 1], [], []>} : vector<4x32xbf16>, vector<32x96xbf16>, vector<4x96xf32> -> vector<4x96xf32>
    %c1_81 = arith.constant 1 : index
    %c0_82 = arith.constant 0 : index
    %c0_83 = arith.constant 0 : index
    %176 = vector.load %arg9[%c1_81, %c0_82, %c0_83] : memref<2x1x96xf32, #tpu.memory_space<vmem>>, vector<1x1x96xf32>
    %177 = vector.shape_cast %176 : vector<1x1x96xf32> to vector<1x96xf32>
    %178 = vector.broadcast %177 : vector<1x96xf32> to vector<4x96xf32>
    %179 = arith.addf %175, %178 : vector<4x96xf32>
    %180 = vector.extract_strided_slice %179 {offsets = [0, 0], sizes = [4, 16], strides = [1, 1]} : vector<4x96xf32> to vector<4x16xf32>
    %181 = vector.extract_strided_slice %179 {offsets = [0, 16], sizes = [4, 16], strides = [1, 1]} : vector<4x96xf32> to vector<4x16xf32>
    %182 = vector.shape_cast %180 : vector<4x16xf32> to vector<1x4x16xf32>
    %183 = vector.shape_cast %181 : vector<4x16xf32> to vector<1x4x16xf32>
    %184 = tpu.concatenate %182, %183 in 0 : vector<1x4x16xf32>, vector<1x4x16xf32> -> vector<2x4x16xf32>
    %185 = vector.extract_strided_slice %179 {offsets = [0, 32], sizes = [4, 16], strides = [1, 1]} : vector<4x96xf32> to vector<4x16xf32>
    %186 = vector.extract_strided_slice %179 {offsets = [0, 48], sizes = [4, 16], strides = [1, 1]} : vector<4x96xf32> to vector<4x16xf32>
    %187 = vector.shape_cast %185 : vector<4x16xf32> to vector<1x4x16xf32>
    %188 = vector.shape_cast %186 : vector<4x16xf32> to vector<1x4x16xf32>
    %189 = tpu.concatenate %187, %188 in 0 : vector<1x4x16xf32>, vector<1x4x16xf32> -> vector<2x4x16xf32>
    %190 = vector.extract_strided_slice %179 {offsets = [0, 64], sizes = [4, 16], strides = [1, 1]} : vector<4x96xf32> to vector<4x16xf32>
    %191 = vector.extract_strided_slice %179 {offsets = [0, 80], sizes = [4, 16], strides = [1, 1]} : vector<4x96xf32> to vector<4x16xf32>
    %192 = vector.shape_cast %190 : vector<4x16xf32> to vector<1x4x16xf32>
    %193 = vector.shape_cast %191 : vector<4x16xf32> to vector<1x4x16xf32>
    %194 = tpu.concatenate %192, %193 in 0 : vector<1x4x16xf32>, vector<1x4x16xf32> -> vector<2x4x16xf32>
    %195 = arith.truncf %184 : vector<2x4x16xf32> to vector<2x4x16xbf16>
    %196 = arith.truncf %189 : vector<2x4x16xf32> to vector<2x4x16xbf16>
    "tpu.trace_start"() <{level = 10 : i32, message = "hqd,hkd->hqk"}> : () -> ()
    %cst_84 = arith.constant dense<0.000000e+00> : vector<2x4x4xf32>
    %197 = tpu.matmul %195, %196, %cst_84 {dimension_numbers = #tpu.dot_dimension_numbers<[2], [2], [1], [1], [0, 0, 0, 1, 1, 1], [0], [0]>} : vector<2x4x16xbf16>, vector<2x4x16xbf16>, vector<2x4x4xf32> -> vector<2x4x4xf32>
    "tpu.trace_stop"() : () -> ()
    %cst_85 = arith.constant 2.500000e-01 : f32
    %198 = vector.broadcast %cst_85 : f32 to vector<2x4x4xf32>
    %199 = arith.mulf %197, %198 : vector<2x4x4xf32>
    %cst_86 = arith.constant dense<0xFF800000> : vector<2x4xf32>
    %200 = vector.multi_reduction <maximumf>, %199, %cst_86 [2] : vector<2x4x4xf32> to vector<2x4xf32>
    %201 = vector.shape_cast %200 : vector<2x4xf32> to vector<2x4x1xf32>
    %202 = vector.broadcast %201 : vector<2x4x1xf32> to vector<2x4x4xf32>
    %203 = arith.subf %199, %202 : vector<2x4x4xf32>
    %204 = math.exp %203 : vector<2x4x4xf32>
    %cst_87 = arith.constant dense<0.000000e+00> : vector<2x4xf32>
    %205 = vector.multi_reduction <add>, %204, %cst_87 [2] : vector<2x4x4xf32> to vector<2x4xf32>
    %206 = vector.shape_cast %205 : vector<2x4xf32> to vector<2x4x1xf32>
    %207 = tpu.reciprocal %206 {approx = true} : vector<2x4x1xf32> -> vector<2x4x1xf32>
    %208 = vector.broadcast %207 : vector<2x4x1xf32> to vector<2x4x4xf32>
    %209 = arith.mulf %204, %208 : vector<2x4x4xf32>
    %210 = arith.truncf %209 : vector<2x4x4xf32> to vector<2x4x4xbf16>
    %211 = arith.truncf %194 : vector<2x4x16xf32> to vector<2x4x16xbf16>
    "tpu.trace_start"() <{level = 10 : i32, message = "hqk,hkd->hqd"}> : () -> ()
    %cst_88 = arith.constant dense<0.000000e+00> : vector<2x4x16xf32>
    %212 = tpu.matmul %210, %211, %cst_88 {dimension_numbers = #tpu.dot_dimension_numbers<[2], [1], [1], [2], [0, 0, 0, 1, 1, 2], [0], [0]>} : vector<2x4x4xbf16>, vector<2x4x16xbf16>, vector<2x4x16xf32> -> vector<2x4x16xf32>
    "tpu.trace_stop"() : () -> ()
    %213 = vector.extract_strided_slice %212 {offsets = [0, 0, 0], sizes = [1, 4, 16], strides = [1, 1, 1]} : vector<2x4x16xf32> to vector<1x4x16xf32>
    %214 = vector.shape_cast %213 : vector<1x4x16xf32> to vector<4x16xf32>
    %215 = vector.extract_strided_slice %212 {offsets = [1, 0, 0], sizes = [1, 4, 16], strides = [1, 1, 1]} : vector<2x4x16xf32> to vector<1x4x16xf32>
    %216 = vector.shape_cast %215 : vector<1x4x16xf32> to vector<4x16xf32>
    %217 = tpu.concatenate %214, %216 in 1 : vector<4x16xf32>, vector<4x16xf32> -> vector<4x32xf32>
    %218 = arith.truncf %217 : vector<4x32xf32> to vector<4x32xbf16>
    %c1_89 = arith.constant 1 : index
    %c0_90 = arith.constant 0 : index
    %c0_91 = arith.constant 0 : index
    %219 = vector.load %arg10[%c1_89, %c0_90, %c0_91] : memref<2x32x32xbf16, #tpu.memory_space<vmem>>, vector<1x32x32xbf16>
    %220 = vector.shape_cast %219 : vector<1x32x32xbf16> to vector<32x32xbf16>
    %cst_92 = arith.constant dense<0.000000e+00> : vector<4x32xf32>
    %221 = tpu.matmul %218, %220, %cst_92 {dimension_numbers = #tpu.dot_dimension_numbers<[1], [0], [0], [1], [0, 0, 1, 1], [], []>} : vector<4x32xbf16>, vector<32x32xbf16>, vector<4x32xf32> -> vector<4x32xf32>
    %c1_93 = arith.constant 1 : index
    %c0_94 = arith.constant 0 : index
    %c0_95 = arith.constant 0 : index
    %222 = vector.load %arg11[%c1_93, %c0_94, %c0_95] : memref<2x1x32xf32, #tpu.memory_space<vmem>>, vector<1x1x32xf32>
    %223 = vector.shape_cast %222 : vector<1x1x32xf32> to vector<1x32xf32>
    %224 = vector.broadcast %223 : vector<1x32xf32> to vector<4x32xf32>
    %225 = arith.addf %221, %224 : vector<4x32xf32>
    %226 = arith.addf %225, %171 : vector<4x32xf32>
    %c1_96 = arith.constant 1 : index
    %c0_97 = arith.constant 0 : index
    %c0_98 = arith.constant 0 : index
    %227 = vector.load %arg12[%c1_96, %c0_97, %c0_98] : memref<2x1x32xf32, #tpu.memory_space<vmem>>, vector<1x1x32xf32>
    %228 = vector.shape_cast %227 : vector<1x1x32xf32> to vector<1x32xf32>
    %c1_99 = arith.constant 1 : index
    %c0_100 = arith.constant 0 : index
    %c0_101 = arith.constant 0 : index
    %229 = vector.load %arg13[%c1_99, %c0_100, %c0_101] : memref<2x1x32xf32, #tpu.memory_space<vmem>>, vector<1x1x32xf32>
    %230 = vector.shape_cast %229 : vector<1x1x32xf32> to vector<1x32xf32>
    %cst_102 = arith.constant dense<0.000000e+00> : vector<4xf32>
    %231 = vector.multi_reduction <add>, %226, %cst_102 [1] : vector<4x32xf32> to vector<4xf32>
    %232 = vector.shape_cast %231 : vector<4xf32> to vector<4x1xf32>
    %cst_103 = arith.constant 3.200000e+01 : f32
    %233 = vector.broadcast %cst_103 : f32 to vector<4x1xf32>
    %234 = arith.divf %232, %233 : vector<4x1xf32>
    %235 = vector.broadcast %234 : vector<4x1xf32> to vector<4x32xf32>
    %236 = arith.subf %226, %235 : vector<4x32xf32>
    %237 = arith.mulf %236, %236 : vector<4x32xf32>
    %cst_104 = arith.constant dense<0.000000e+00> : vector<4xf32>
    %238 = vector.multi_reduction <add>, %237, %cst_104 [1] : vector<4x32xf32> to vector<4xf32>
    %239 = vector.shape_cast %238 : vector<4xf32> to vector<4x1xf32>
    %cst_105 = arith.constant 3.200000e+01 : f32
    %240 = vector.broadcast %cst_105 : f32 to vector<4x1xf32>
    %241 = arith.divf %239, %240 : vector<4x1xf32>
    %cst_106 = arith.constant 9.99999996E-13 : f32
    %242 = vector.broadcast %cst_106 : f32 to vector<4x1xf32>
    %243 = arith.addf %241, %242 : vector<4x1xf32>
    %244 = math.rsqrt %243 : vector<4x1xf32>
    %245 = vector.broadcast %244 : vector<4x1xf32> to vector<4x32xf32>
    %246 = arith.mulf %236, %245 : vector<4x32xf32>
    %247 = vector.broadcast %228 : vector<1x32xf32> to vector<4x32xf32>
    %248 = arith.mulf %246, %247 : vector<4x32xf32>
    %249 = vector.broadcast %230 : vector<1x32xf32> to vector<4x32xf32>
    %250 = arith.addf %248, %249 : vector<4x32xf32>
    %251 = arith.truncf %250 : vector<4x32xf32> to vector<4x32xbf16>
    %c1_107 = arith.constant 1 : index
    %c0_108 = arith.constant 0 : index
    %c0_109 = arith.constant 0 : index
    %252 = vector.load %arg14[%c1_107, %c0_108, %c0_109] : memref<2x32x64xbf16, #tpu.memory_space<vmem>>, vector<1x32x64xbf16>
    %253 = vector.shape_cast %252 : vector<1x32x64xbf16> to vector<32x64xbf16>
    %cst_110 = arith.constant dense<0.000000e+00> : vector<4x64xf32>
    %254 = tpu.matmul %251, %253, %cst_110 {dimension_numbers = #tpu.dot_dimension_numbers<[1], [0], [0], [1], [0, 0, 1, 1], [], []>} : vector<4x32xbf16>, vector<32x64xbf16>, vector<4x64xf32> -> vector<4x64xf32>
    %c1_111 = arith.constant 1 : index
    %c0_112 = arith.constant 0 : index
    %c0_113 = arith.constant 0 : index
    %255 = vector.load %arg15[%c1_111, %c0_112, %c0_113] : memref<2x1x64xf32, #tpu.memory_space<vmem>>, vector<1x1x64xf32>
    %256 = vector.shape_cast %255 : vector<1x1x64xf32> to vector<1x64xf32>
    %257 = vector.broadcast %256 : vector<1x64xf32> to vector<4x64xf32>
    %258 = arith.addf %254, %257 : vector<4x64xf32>
    %259 = arith.mulf %258, %258 : vector<4x64xf32>
    %260 = arith.mulf %258, %259 : vector<4x64xf32>
    %cst_114 = arith.constant 4.471500e-02 : f32
    %261 = vector.broadcast %cst_114 : f32 to vector<4x64xf32>
    %262 = arith.mulf %261, %260 : vector<4x64xf32>
    %263 = arith.addf %258, %262 : vector<4x64xf32>
    %cst_115 = arith.constant 0.797884583 : f32
    %264 = vector.broadcast %cst_115 : f32 to vector<4x64xf32>
    %265 = arith.mulf %264, %263 : vector<4x64xf32>
    %266 = math.tanh %265 : vector<4x64xf32>
    %cst_116 = arith.constant 1.000000e+00 : f32
    %267 = vector.broadcast %cst_116 : f32 to vector<4x64xf32>
    %268 = arith.addf %267, %266 : vector<4x64xf32>
    %cst_117 = arith.constant 5.000000e-01 : f32
    %269 = vector.broadcast %cst_117 : f32 to vector<4x64xf32>
    %270 = arith.mulf %269, %268 : vector<4x64xf32>
    %271 = arith.mulf %258, %270 : vector<4x64xf32>
    %272 = arith.truncf %271 : vector<4x64xf32> to vector<4x64xbf16>
    %c1_118 = arith.constant 1 : index
    %c0_119 = arith.constant 0 : index
    %c0_120 = arith.constant 0 : index
    %273 = vector.load %arg16[%c1_118, %c0_119, %c0_120] : memref<2x64x32xbf16, #tpu.memory_space<vmem>>, vector<1x64x32xbf16>
    %274 = vector.shape_cast %273 : vector<1x64x32xbf16> to vector<64x32xbf16>
    %cst_121 = arith.constant dense<0.000000e+00> : vector<4x32xf32>
    %275 = tpu.matmul %272, %274, %cst_121 {dimension_numbers = #tpu.dot_dimension_numbers<[1], [0], [0], [1], [0, 0, 1, 1], [], []>} : vector<4x64xbf16>, vector<64x32xbf16>, vector<4x32xf32> -> vector<4x32xf32>
    %c1_122 = arith.constant 1 : index
    %c0_123 = arith.constant 0 : index
    %c0_124 = arith.constant 0 : index
    %276 = vector.load %arg17[%c1_122, %c0_123, %c0_124] : memref<2x1x32xf32, #tpu.memory_space<vmem>>, vector<1x1x32xf32>
    %277 = vector.shape_cast %276 : vector<1x1x32xf32> to vector<1x32xf32>
    %278 = vector.broadcast %277 : vector<1x32xf32> to vector<4x32xf32>
    %279 = arith.addf %275, %278 : vector<4x32xf32>
    %280 = arith.addf %279, %250 : vector<4x32xf32>
    %c1_125 = arith.constant 1 : index
    %c0_126 = arith.constant 0 : index
    %c0_127 = arith.constant 0 : index
    %281 = vector.load %arg18[%c1_125, %c0_126, %c0_127] : memref<2x1x32xf32, #tpu.memory_space<vmem>>, vector<1x1x32xf32>
    %282 = vector.shape_cast %281 : vector<1x1x32xf32> to vector<1x32xf32>
    %c1_128 = arith.constant 1 : index
    %c0_129 = arith.constant 0 : index
    %c0_130 = arith.constant 0 : index
    %283 = vector.load %arg19[%c1_128, %c0_129, %c0_130] : memref<2x1x32xf32, #tpu.memory_space<vmem>>, vector<1x1x32xf32>
    %284 = vector.shape_cast %283 : vector<1x1x32xf32> to vector<1x32xf32>
    %cst_131 = arith.constant dense<0.000000e+00> : vector<4xf32>
    %285 = vector.multi_reduction <add>, %280, %cst_131 [1] : vector<4x32xf32> to vector<4xf32>
    %286 = vector.shape_cast %285 : vector<4xf32> to vector<4x1xf32>
    %cst_132 = arith.constant 3.200000e+01 : f32
    %287 = vector.broadcast %cst_132 : f32 to vector<4x1xf32>
    %288 = arith.divf %286, %287 : vector<4x1xf32>
    %289 = vector.broadcast %288 : vector<4x1xf32> to vector<4x32xf32>
    %290 = arith.subf %280, %289 : vector<4x32xf32>
    %291 = arith.mulf %290, %290 : vector<4x32xf32>
    %cst_133 = arith.constant dense<0.000000e+00> : vector<4xf32>
    %292 = vector.multi_reduction <add>, %291, %cst_133 [1] : vector<4x32xf32> to vector<4xf32>
    %293 = vector.shape_cast %292 : vector<4xf32> to vector<4x1xf32>
    %cst_134 = arith.constant 3.200000e+01 : f32
    %294 = vector.broadcast %cst_134 : f32 to vector<4x1xf32>
    %295 = arith.divf %293, %294 : vector<4x1xf32>
    %cst_135 = arith.constant 9.99999996E-13 : f32
    %296 = vector.broadcast %cst_135 : f32 to vector<4x1xf32>
    %297 = arith.addf %295, %296 : vector<4x1xf32>
    %298 = math.rsqrt %297 : vector<4x1xf32>
    %299 = vector.broadcast %298 : vector<4x1xf32> to vector<4x32xf32>
    %300 = arith.mulf %290, %299 : vector<4x32xf32>
    %301 = vector.broadcast %282 : vector<1x32xf32> to vector<4x32xf32>
    %302 = arith.mulf %300, %301 : vector<4x32xf32>
    %303 = vector.broadcast %284 : vector<1x32xf32> to vector<4x32xf32>
    %304 = arith.addf %302, %303 : vector<4x32xf32>
    %305 = arith.truncf %304 : vector<4x32xf32> to vector<4x32xbf16>
    %c0_136 = arith.constant 0 : index
    %c0_137 = arith.constant 0 : index
    %306 = vector.load %arg20[%c0_136, %c0_137] : memref<32x64xbf16, #tpu.memory_space<vmem>>, vector<32x64xbf16>
    %cst_138 = arith.constant dense<0.000000e+00> : vector<4x64xf32>
    %307 = tpu.matmul %305, %306, %cst_138 {dimension_numbers = #tpu.dot_dimension_numbers<[1], [0], [0], [1], [0, 0, 1, 1], [], []>} : vector<4x32xbf16>, vector<32x64xbf16>, vector<4x64xf32> -> vector<4x64xf32>
    %c0_139 = arith.constant 0 : index
    %c0_140 = arith.constant 0 : index
    %308 = vector.load %arg22[%c0_139, %c0_140] : memref<1x64xf32, #tpu.memory_space<vmem>>, vector<1x64xf32>
    %309 = vector.broadcast %308 : vector<1x64xf32> to vector<4x64xf32>
    %310 = arith.addf %307, %309 : vector<4x64xf32>
    %cst_141 = arith.constant 0.000000e+00 : f32
    %311 = vector.broadcast %cst_141 : f32 to vector<1x16xf32>
    %cst_142 = arith.constant 0.000000e+00 : f32
    %312 = vector.broadcast %cst_142 : f32 to vector<1x16xf32>
    %313 = vector.extract_strided_slice %310 {offsets = [0, 0], sizes = [1, 64], strides = [1, 1]} : vector<4x64xf32> to vector<1x64xf32>
    %314 = arith.truncf %311 : vector<1x16xf32> to vector<1x16xbf16>
    %c0_143 = arith.constant 0 : index
    %c0_144 = arith.constant 0 : index
    %315 = vector.load %arg21[%c0_143, %c0_144] : memref<16x64xbf16, #tpu.memory_space<vmem>>, vector<16x64xbf16>
    %cst_145 = arith.constant dense<0.000000e+00> : vector<1x64xf32>
    %316 = tpu.matmul %314, %315, %cst_145 {dimension_numbers = #tpu.dot_dimension_numbers<[1], [0], [0], [1], [0, 0, 1, 1], [], []>} : vector<1x16xbf16>, vector<16x64xbf16>, vector<1x64xf32> -> vector<1x64xf32>
    %317 = arith.addf %313, %316 : vector<1x64xf32>
    %318 = vector.extract_strided_slice %317 {offsets = [0, 0], sizes = [1, 16], strides = [1, 1]} : vector<1x64xf32> to vector<1x16xf32>
    %319 = arith.negf %318 : vector<1x16xf32>
    %320 = math.exp %319 : vector<1x16xf32>
    %cst_146 = arith.constant 1.000000e+00 : f32
    %321 = vector.broadcast %cst_146 : f32 to vector<1x16xf32>
    %322 = arith.addf %321, %320 : vector<1x16xf32>
    %323 = arith.divf %321, %322 : vector<1x16xf32>
    %324 = vector.extract_strided_slice %317 {offsets = [0, 16], sizes = [1, 16], strides = [1, 1]} : vector<1x64xf32> to vector<1x16xf32>
    %325 = arith.negf %324 : vector<1x16xf32>
    %326 = math.exp %325 : vector<1x16xf32>
    %cst_147 = arith.constant 1.000000e+00 : f32
    %327 = vector.broadcast %cst_147 : f32 to vector<1x16xf32>
    %328 = arith.addf %327, %326 : vector<1x16xf32>
    %329 = arith.divf %327, %328 : vector<1x16xf32>
    %330 = vector.extract_strided_slice %317 {offsets = [0, 32], sizes = [1, 16], strides = [1, 1]} : vector<1x64xf32> to vector<1x16xf32>
    %331 = math.tanh %330 : vector<1x16xf32>
    %332 = vector.extract_strided_slice %317 {offsets = [0, 48], sizes = [1, 16], strides = [1, 1]} : vector<1x64xf32> to vector<1x16xf32>
    %333 = arith.negf %332 : vector<1x16xf32>
    %334 = math.exp %333 : vector<1x16xf32>
    %cst_148 = arith.constant 1.000000e+00 : f32
    %335 = vector.broadcast %cst_148 : f32 to vector<1x16xf32>
    %336 = arith.addf %335, %334 : vector<1x16xf32>
    %337 = arith.divf %335, %336 : vector<1x16xf32>
    %338 = arith.mulf %329, %312 : vector<1x16xf32>
    %339 = arith.mulf %323, %331 : vector<1x16xf32>
    %340 = arith.addf %338, %339 : vector<1x16xf32>
    %341 = math.tanh %340 : vector<1x16xf32>
    %342 = arith.mulf %337, %341 : vector<1x16xf32>
    %343 = vector.extract_strided_slice %310 {offsets = [1, 0], sizes = [1, 64], strides = [1, 1]} : vector<4x64xf32> to vector<1x64xf32>
    %344 = arith.truncf %342 : vector<1x16xf32> to vector<1x16xbf16>
    %c0_149 = arith.constant 0 : index
    %c0_150 = arith.constant 0 : index
    %345 = vector.load %arg21[%c0_149, %c0_150] : memref<16x64xbf16, #tpu.memory_space<vmem>>, vector<16x64xbf16>
    %cst_151 = arith.constant dense<0.000000e+00> : vector<1x64xf32>
    %346 = tpu.matmul %344, %345, %cst_151 {dimension_numbers = #tpu.dot_dimension_numbers<[1], [0], [0], [1], [0, 0, 1, 1], [], []>} : vector<1x16xbf16>, vector<16x64xbf16>, vector<1x64xf32> -> vector<1x64xf32>
    %347 = arith.addf %343, %346 : vector<1x64xf32>
    %348 = vector.extract_strided_slice %347 {offsets = [0, 0], sizes = [1, 16], strides = [1, 1]} : vector<1x64xf32> to vector<1x16xf32>
    %349 = arith.negf %348 : vector<1x16xf32>
    %350 = math.exp %349 : vector<1x16xf32>
    %cst_152 = arith.constant 1.000000e+00 : f32
    %351 = vector.broadcast %cst_152 : f32 to vector<1x16xf32>
    %352 = arith.addf %351, %350 : vector<1x16xf32>
    %353 = arith.divf %351, %352 : vector<1x16xf32>
    %354 = vector.extract_strided_slice %347 {offsets = [0, 16], sizes = [1, 16], strides = [1, 1]} : vector<1x64xf32> to vector<1x16xf32>
    %355 = arith.negf %354 : vector<1x16xf32>
    %356 = math.exp %355 : vector<1x16xf32>
    %cst_153 = arith.constant 1.000000e+00 : f32
    %357 = vector.broadcast %cst_153 : f32 to vector<1x16xf32>
    %358 = arith.addf %357, %356 : vector<1x16xf32>
    %359 = arith.divf %357, %358 : vector<1x16xf32>
    %360 = vector.extract_strided_slice %347 {offsets = [0, 32], sizes = [1, 16], strides = [1, 1]} : vector<1x64xf32> to vector<1x16xf32>
    %361 = math.tanh %360 : vector<1x16xf32>
    %362 = vector.extract_strided_slice %347 {offsets = [0, 48], sizes = [1, 16], strides = [1, 1]} : vector<1x64xf32> to vector<1x16xf32>
    %363 = arith.negf %362 : vector<1x16xf32>
    %364 = math.exp %363 : vector<1x16xf32>
    %cst_154 = arith.constant 1.000000e+00 : f32
    %365 = vector.broadcast %cst_154 : f32 to vector<1x16xf32>
    %366 = arith.addf %365, %364 : vector<1x16xf32>
    %367 = arith.divf %365, %366 : vector<1x16xf32>
    %368 = arith.mulf %359, %340 : vector<1x16xf32>
    %369 = arith.mulf %353, %361 : vector<1x16xf32>
    %370 = arith.addf %368, %369 : vector<1x16xf32>
    %371 = math.tanh %370 : vector<1x16xf32>
    %372 = arith.mulf %367, %371 : vector<1x16xf32>
    %373 = vector.extract_strided_slice %310 {offsets = [2, 0], sizes = [1, 64], strides = [1, 1]} : vector<4x64xf32> to vector<1x64xf32>
    %374 = arith.truncf %372 : vector<1x16xf32> to vector<1x16xbf16>
    %c0_155 = arith.constant 0 : index
    %c0_156 = arith.constant 0 : index
    %375 = vector.load %arg21[%c0_155, %c0_156] : memref<16x64xbf16, #tpu.memory_space<vmem>>, vector<16x64xbf16>
    %cst_157 = arith.constant dense<0.000000e+00> : vector<1x64xf32>
    %376 = tpu.matmul %374, %375, %cst_157 {dimension_numbers = #tpu.dot_dimension_numbers<[1], [0], [0], [1], [0, 0, 1, 1], [], []>} : vector<1x16xbf16>, vector<16x64xbf16>, vector<1x64xf32> -> vector<1x64xf32>
    %377 = arith.addf %373, %376 : vector<1x64xf32>
    %378 = vector.extract_strided_slice %377 {offsets = [0, 0], sizes = [1, 16], strides = [1, 1]} : vector<1x64xf32> to vector<1x16xf32>
    %379 = arith.negf %378 : vector<1x16xf32>
    %380 = math.exp %379 : vector<1x16xf32>
    %cst_158 = arith.constant 1.000000e+00 : f32
    %381 = vector.broadcast %cst_158 : f32 to vector<1x16xf32>
    %382 = arith.addf %381, %380 : vector<1x16xf32>
    %383 = arith.divf %381, %382 : vector<1x16xf32>
    %384 = vector.extract_strided_slice %377 {offsets = [0, 16], sizes = [1, 16], strides = [1, 1]} : vector<1x64xf32> to vector<1x16xf32>
    %385 = arith.negf %384 : vector<1x16xf32>
    %386 = math.exp %385 : vector<1x16xf32>
    %cst_159 = arith.constant 1.000000e+00 : f32
    %387 = vector.broadcast %cst_159 : f32 to vector<1x16xf32>
    %388 = arith.addf %387, %386 : vector<1x16xf32>
    %389 = arith.divf %387, %388 : vector<1x16xf32>
    %390 = vector.extract_strided_slice %377 {offsets = [0, 32], sizes = [1, 16], strides = [1, 1]} : vector<1x64xf32> to vector<1x16xf32>
    %391 = math.tanh %390 : vector<1x16xf32>
    %392 = vector.extract_strided_slice %377 {offsets = [0, 48], sizes = [1, 16], strides = [1, 1]} : vector<1x64xf32> to vector<1x16xf32>
    %393 = arith.negf %392 : vector<1x16xf32>
    %394 = math.exp %393 : vector<1x16xf32>
    %cst_160 = arith.constant 1.000000e+00 : f32
    %395 = vector.broadcast %cst_160 : f32 to vector<1x16xf32>
    %396 = arith.addf %395, %394 : vector<1x16xf32>
    %397 = arith.divf %395, %396 : vector<1x16xf32>
    %398 = arith.mulf %389, %370 : vector<1x16xf32>
    %399 = arith.mulf %383, %391 : vector<1x16xf32>
    %400 = arith.addf %398, %399 : vector<1x16xf32>
    %401 = math.tanh %400 : vector<1x16xf32>
    %402 = arith.mulf %397, %401 : vector<1x16xf32>
    %403 = vector.extract_strided_slice %310 {offsets = [3, 0], sizes = [1, 64], strides = [1, 1]} : vector<4x64xf32> to vector<1x64xf32>
    %404 = arith.truncf %402 : vector<1x16xf32> to vector<1x16xbf16>
    %c0_161 = arith.constant 0 : index
    %c0_162 = arith.constant 0 : index
    %405 = vector.load %arg21[%c0_161, %c0_162] : memref<16x64xbf16, #tpu.memory_space<vmem>>, vector<16x64xbf16>
    %cst_163 = arith.constant dense<0.000000e+00> : vector<1x64xf32>
    %406 = tpu.matmul %404, %405, %cst_163 {dimension_numbers = #tpu.dot_dimension_numbers<[1], [0], [0], [1], [0, 0, 1, 1], [], []>} : vector<1x16xbf16>, vector<16x64xbf16>, vector<1x64xf32> -> vector<1x64xf32>
    %407 = arith.addf %403, %406 : vector<1x64xf32>
    %408 = vector.extract_strided_slice %407 {offsets = [0, 0], sizes = [1, 16], strides = [1, 1]} : vector<1x64xf32> to vector<1x16xf32>
    %409 = arith.negf %408 : vector<1x16xf32>
    %410 = math.exp %409 : vector<1x16xf32>
    %cst_164 = arith.constant 1.000000e+00 : f32
    %411 = vector.broadcast %cst_164 : f32 to vector<1x16xf32>
    %412 = arith.addf %411, %410 : vector<1x16xf32>
    %413 = arith.divf %411, %412 : vector<1x16xf32>
    %414 = vector.extract_strided_slice %407 {offsets = [0, 16], sizes = [1, 16], strides = [1, 1]} : vector<1x64xf32> to vector<1x16xf32>
    %415 = arith.negf %414 : vector<1x16xf32>
    %416 = math.exp %415 : vector<1x16xf32>
    %cst_165 = arith.constant 1.000000e+00 : f32
    %417 = vector.broadcast %cst_165 : f32 to vector<1x16xf32>
    %418 = arith.addf %417, %416 : vector<1x16xf32>
    %419 = arith.divf %417, %418 : vector<1x16xf32>
    %420 = vector.extract_strided_slice %407 {offsets = [0, 32], sizes = [1, 16], strides = [1, 1]} : vector<1x64xf32> to vector<1x16xf32>
    %421 = math.tanh %420 : vector<1x16xf32>
    %422 = vector.extract_strided_slice %407 {offsets = [0, 48], sizes = [1, 16], strides = [1, 1]} : vector<1x64xf32> to vector<1x16xf32>
    %423 = arith.negf %422 : vector<1x16xf32>
    %424 = math.exp %423 : vector<1x16xf32>
    %cst_166 = arith.constant 1.000000e+00 : f32
    %425 = vector.broadcast %cst_166 : f32 to vector<1x16xf32>
    %426 = arith.addf %425, %424 : vector<1x16xf32>
    %427 = arith.divf %425, %426 : vector<1x16xf32>
    %428 = arith.mulf %419, %400 : vector<1x16xf32>
    %429 = arith.mulf %413, %421 : vector<1x16xf32>
    %430 = arith.addf %428, %429 : vector<1x16xf32>
    %431 = math.tanh %430 : vector<1x16xf32>
    %432 = arith.mulf %427, %431 : vector<1x16xf32>
    %433 = tpu.concatenate %342, %372, %402, %432 in 1 : vector<1x16xf32>, vector<1x16xf32>, vector<1x16xf32>, vector<1x16xf32> -> vector<1x64xf32>
    %434 = arith.truncf %433 : vector<1x64xf32> to vector<1x64xbf16>
    %c0_167 = arith.constant 0 : index
    %c0_168 = arith.constant 0 : index
    %435 = vector.load %arg23[%c0_167, %c0_168] : memref<64x64xbf16, #tpu.memory_space<vmem>>, vector<64x64xbf16>
    %cst_169 = arith.constant dense<0.000000e+00> : vector<1x64xf32>
    %436 = tpu.matmul %434, %435, %cst_169 {dimension_numbers = #tpu.dot_dimension_numbers<[1], [0], [0], [1], [0, 0, 1, 1], [], []>} : vector<1x64xbf16>, vector<64x64xbf16>, vector<1x64xf32> -> vector<1x64xf32>
    %c0_170 = arith.constant 0 : index
    %c0_171 = arith.constant 0 : index
    %437 = vector.load %arg24[%c0_170, %c0_171] : memref<1x64xf32, #tpu.memory_space<vmem>>, vector<1x64xf32>
    %438 = arith.addf %436, %437 : vector<1x64xf32>
    %c0_172 = arith.constant 0 : index
    %c0_173 = arith.constant 0 : index
    %c0_174 = arith.constant 0 : index
    %439 = vector.load %arg25[%c0_172, %c0_173, %c0_174] : memref<1x1x64xf32, #tpu.memory_space<vmem>>, vector<1x1x64xf32>
    %440 = vector.shape_cast %439 : vector<1x1x64xf32> to vector<1x64xf32>
    %441 = vector.shape_cast %438 : vector<1x64xf32> to vector<1x1x64xf32>
    tpu.vector_store %arg25[%c0_172, %c0_173, %c0_174], %441 {strides = array<i32>} : memref<1x1x64xf32, #tpu.memory_space<vmem>>, vector<1x1x64xf32>,
    return
  }
  func.func @transform_0(%arg0: i32) -> (i32, i32, i32) {
    %c0_i32 = arith.constant 0 : i32
    %c0_i32_0 = arith.constant 0 : i32
    %c0_i32_1 = arith.constant 0 : i32
    return %arg0, %c0_i32, %c0_i32_0 : i32, i32, i32
  }
  func.func @transform_1(%arg0: i32) -> (i32, i32) {
    %c0_i32 = arith.constant 0 : i32
    %c0_i32_0 = arith.constant 0 : i32
    %c0_i32_1 = arith.constant 0 : i32
    return %c0_i32, %c0_i32_0 : i32, i32
  }
  func.func @transform_2(%arg0: i32) -> (i32, i32) {
    %c0_i32 = arith.constant 0 : i32
    %c0_i32_0 = arith.constant 0 : i32
    %c0_i32_1 = arith.constant 0 : i32
    return %c0_i32, %c0_i32_0 : i32, i32
  }
  func.func @transform_3(%arg0: i32) -> (i32, i32) {
    %c0_i32 = arith.constant 0 : i32
    %c0_i32_0 = arith.constant 0 : i32
    %c0_i32_1 = arith.constant 0 : i32
    return %c0_i32, %c0_i32_0 : i32, i32
  }
  func.func @transform_4(%arg0: i32) -> (i32, i32) {
    %c0_i32 = arith.constant 0 : i32
    %c0_i32_0 = arith.constant 0 : i32
    %c0_i32_1 = arith.constant 0 : i32
    return %c0_i32, %c0_i32_0 : i32, i32
  }
  func.func @transform_5(%arg0: i32) -> (i32, i32) {
    %c0_i32 = arith.constant 0 : i32
    %c0_i32_0 = arith.constant 0 : i32
    %c0_i32_1 = arith.constant 0 : i32
    return %c0_i32, %c0_i32_0 : i32, i32
  }
  func.func @transform_6(%arg0: i32) -> (i32, i32) {
    %c0_i32 = arith.constant 0 : i32
    %c0_i32_0 = arith.constant 0 : i32
    %c0_i32_1 = arith.constant 0 : i32
    return %c0_i32, %c0_i32_0 : i32, i32
  }
  func.func @transform_7(%arg0: i32) -> (i32, i32, i32) {
    %c0_i32 = arith.constant 0 : i32
    %c0_i32_0 = arith.constant 0 : i32
    %c0_i32_1 = arith.constant 0 : i32
    %c0_i32_2 = arith.constant 0 : i32
    return %c0_i32, %c0_i32_0, %c0_i32_1 : i32, i32, i32
  }
  func.func @transform_8(%arg0: i32) -> (i32, i32, i32) {
    %c0_i32 = arith.constant 0 : i32
    %c0_i32_0 = arith.constant 0 : i32
    %c0_i32_1 = arith.constant 0 : i32
    %c0_i32_2 = arith.constant 0 : i32
    return %c0_i32, %c0_i32_0, %c0_i32_1 : i32, i32, i32
  }
  func.func @transform_9(%arg0: i32) -> (i32, i32, i32) {
    %c0_i32 = arith.constant 0 : i32
    %c0_i32_0 = arith.constant 0 : i32
    %c0_i32_1 = arith.constant 0 : i32
    %c0_i32_2 = arith.constant 0 : i32
    return %c0_i32, %c0_i32_0, %c0_i32_1 : i32, i32, i32
  }
  func.func @transform_10(%arg0: i32) -> (i32, i32, i32) {
    %c0_i32 = arith.constant 0 : i32
    %c0_i32_0 = arith.constant 0 : i32
    %c0_i32_1 = arith.constant 0 : i32
    %c0_i32_2 = arith.constant 0 : i32
    return %c0_i32, %c0_i32_0, %c0_i32_1 : i32, i32, i32
  }
  func.func @transform_11(%arg0: i32) -> (i32, i32, i32) {
    %c0_i32 = arith.constant 0 : i32
    %c0_i32_0 = arith.constant 0 : i32
    %c0_i32_1 = arith.constant 0 : i32
    %c0_i32_2 = arith.constant 0 : i32
    return %c0_i32, %c0_i32_0, %c0_i32_1 : i32, i32, i32
  }
  func.func @transform_12(%arg0: i32) -> (i32, i32, i32) {
    %c0_i32 = arith.constant 0 : i32
    %c0_i32_0 = arith.constant 0 : i32
    %c0_i32_1 = arith.constant 0 : i32
    %c0_i32_2 = arith.constant 0 : i32
    return %c0_i32, %c0_i32_0, %c0_i32_1 : i32, i32, i32
  }
  func.func @transform_13(%arg0: i32) -> (i32, i32, i32) {
    %c0_i32 = arith.constant 0 : i32
    %c0_i32_0 = arith.constant 0 : i32
    %c0_i32_1 = arith.constant 0 : i32
    %c0_i32_2 = arith.constant 0 : i32
    return %c0_i32, %c0_i32_0, %c0_i32_1 : i32, i32, i32
  }
  func.func @transform_14(%arg0: i32) -> (i32, i32, i32) {
    %c0_i32 = arith.constant 0 : i32
    %c0_i32_0 = arith.constant 0 : i32
    %c0_i32_1 = arith.constant 0 : i32
    %c0_i32_2 = arith.constant 0 : i32
    return %c0_i32, %c0_i32_0, %c0_i32_1 : i32, i32, i32
  }
  func.func @transform_15(%arg0: i32) -> (i32, i32, i32) {
    %c0_i32 = arith.constant 0 : i32
    %c0_i32_0 = arith.constant 0 : i32
    %c0_i32_1 = arith.constant 0 : i32
    %c0_i32_2 = arith.constant 0 : i32
    return %c0_i32, %c0_i32_0, %c0_i32_1 : i32, i32, i32
  }
  func.func @transform_16(%arg0: i32) -> (i32, i32, i32) {
    %c0_i32 = arith.constant 0 : i32
    %c0_i32_0 = arith.constant 0 : i32
    %c0_i32_1 = arith.constant 0 : i32
    %c0_i32_2 = arith.constant 0 : i32
    return %c0_i32, %c0_i32_0, %c0_i32_1 : i32, i32, i32
  }
  func.func @transform_17(%arg0: i32) -> (i32, i32, i32) {
    %c0_i32 = arith.constant 0 : i32
    %c0_i32_0 = arith.constant 0 : i32
    %c0_i32_1 = arith.constant 0 : i32
    %c0_i32_2 = arith.constant 0 : i32
    return %c0_i32, %c0_i32_0, %c0_i32_1 : i32, i32, i32
  }
  func.func @transform_18(%arg0: i32) -> (i32, i32, i32) {
    %c0_i32 = arith.constant 0 : i32
    %c0_i32_0 = arith.constant 0 : i32
    %c0_i32_1 = arith.constant 0 : i32
    %c0_i32_2 = arith.constant 0 : i32
    return %c0_i32, %c0_i32_0, %c0_i32_1 : i32, i32, i32
  }
  func.func @transform_19(%arg0: i32) -> (i32, i32) {
    %c0_i32 = arith.constant 0 : i32
    %c0_i32_0 = arith.constant 0 : i32
    %c0_i32_1 = arith.constant 0 : i32
    return %c0_i32, %c0_i32_0 : i32, i32
  }
  func.func @transform_20(%arg0: i32) -> (i32, i32) {
    %c0_i32 = arith.constant 0 : i32
    %c0_i32_0 = arith.constant 0 : i32
    %c0_i32_1 = arith.constant 0 : i32
    return %c0_i32, %c0_i32_0 : i32, i32
  }
  func.func @transform_21(%arg0: i32) -> (i32, i32) {
    %c0_i32 = arith.constant 0 : i32
    %c0_i32_0 = arith.constant 0 : i32
    %c0_i32_1 = arith.constant 0 : i32
    return %c0_i32, %c0_i32_0 : i32, i32
  }
  func.func @transform_22(%arg0: i32) -> (i32, i32) {
    %c0_i32 = arith.constant 0 : i32
    %c0_i32_0 = arith.constant 0 : i32
    %c0_i32_1 = arith.constant 0 : i32
    return %c0_i32, %c0_i32_0 : i32, i32
  }
  func.func @transform_23(%arg0: i32) -> (i32, i32) {
    %c0_i32 = arith.constant 0 : i32
    %c0_i32_0 = arith.constant 0 : i32
    %c0_i32_1 = arith.constant 0 : i32
    return %c0_i32, %c0_i32_0 : i32, i32
  }
  func.func @transform_24(%arg0: i32) -> (i32, i32, i32) {
    %c0_i32 = arith.constant 0 : i32
    %c0_i32_0 = arith.constant 0 : i32
    %c0_i32_1 = arith.constant 0 : i32
    return %arg0, %c0_i32, %c0_i32_0 : i32, i32, i32
  }
}

</mosaic_0001>

<bundles_post_ra>
// kernel: _lambda_.1
= control target key start
LH: loop header
LB: loop body
LE: loop exit
PB: predicated region body
PF: predicated region fallthrough
CT: control target
= control target key end

     0   :  { %s5165_s0 = inlined_call_operand.vmem [shape: f32[2,1,64], index: 0, kind: input, shape index: {}]   ;;  %s5166_s1 = inlined_call_operand.vmem [shape: bf16[64,128], index: 1, kind: input, shape index: {}]   ;;  %s5167_s2 = inlined_call_operand.hbm [shape: f32[1,128], index: 2, kind: input, shape index: {}]   ;;  %s5168_s3 = inlined_call_operand.vmem [shape: f32[4,32], index: 3, kind: input, shape index: {}]   ;;  %s5169_s4 = inlined_call_operand.vmem [shape: f32[1,32], index: 4, kind: input, shape index: {}]   ;;  %s5170_s5 = inlined_call_operand.hbm [shape: f32[1,32], index: 5, kind: input, shape index: {}]   ;;  %s5171_s6 = inlined_call_operand.hbm [shape: f32[1,32], index: 6, kind: input, shape index: {}]   ;;  %s5172_s7 = inlined_call_operand.vmem [shape: bf16[2,32,96], index: 7, kind: input, shape index: {}]   ;;  %s5173_s8 = inlined_call_operand.hbm [shape: f32[2,1,96], index: 8, kind: input, shape index: {}]   ;;  %s5174_s9 = inlined_call_operand.vmem [shape: bf16[2,32,32], index: 9, kind: input, shape index: {}]   ;;  %s5175_s10 = inlined_call_operand.hbm [shape: f32[2,1,32], index: 10, kind: input, shape index: {}]   ;;  %s5176_s11 = inlined_call_operand.hbm [shape: f32[2,1,32], index: 11, kind: input, shape index: {}]   ;;  %s5177_s12 = inlined_call_operand.hbm [shape: f32[2,1,32], index: 12, kind: input, shape index: {}]   ;;  %s5178_s13 = inlined_call_operand.vmem [shape: bf16[2,32,64], index: 13, kind: input, shape index: {}]   ;;  %s5179_s14 = inlined_call_operand.hbm [shape: f32[2,1,64], index: 14, kind: input, shape index: {}]   ;;  %s5180_s15 = inlined_call_operand.vmem [shape: bf16[2,64,32], index: 15, kind: input, shape index: {}]   ;;  %s5181_s16 = inlined_call_operand.hbm [shape: f32[2,1,32], index: 16, kind: input, shape index: {}]   ;;  %s5182_s17 = inlined_call_operand.hbm [shape: f32[2,1,32], index: 17, kind: input, shape index: {}]   ;;  %s5183_s18 = inlined_call_operand.hbm [shape: f32[2,1,32], index: 18, kind: input, shape index: {}]   ;;  %s5184_s19 = inlined_call_operand.hbm [shape: bf16[32,64], index: 19, kind: input, shape index: {}]   ;;  %s5185_s20 = inlined_call_operand.hbm [shape: bf16[16,64], index: 20, kind: input, shape index: {}]   ;;  %s5186_s21 = inlined_call_operand.hbm [shape: f32[1,64], index: 21, kind: input, shape index: {}]   ;;  %s5187_s22 = inlined_call_operand.hbm [shape: bf16[64,64], index: 22, kind: input, shape index: {}]   ;;  %s5188_s23 = inlined_call_operand.hbm [shape: f32[1,64], index: 23, kind: input, shape index: {}]   ;;  %s5189_s24 = inlined_call_operand.hbm [shape: f32[2,1,64], index: 24, kind: output, shape index: {}]  }
   0x1   :  { %5221 = sst [smem:[#allocation47_spill]] %s5165_s0 }
   0x2   :  { %5222 = sst [smem:[#allocation48_spill]] %s5166_s1 }
   0x3   :  { %5223 = sst [smem:[#allocation49_spill]] %s5167_s2 }
   0x4   :  { %5224 = sst [smem:[#allocation50_spill]] %s5168_s3 }
   0x5   :  { %5225 = sst [smem:[#allocation51_spill]] %s5169_s4 }
   0x6   :  { %5226 = sst [smem:[#allocation52_spill]] %s5170_s5 }
   0x7   :  { %5227 = sst [smem:[#allocation53_spill]] %s5171_s6 }
   0x8   :  { %5228 = sst [smem:[#allocation54_spill]] %s5172_s7 }
   0x9   :  { %5229 = sst [smem:[#allocation55_spill]] %s5173_s8 }
   0xa   :  { %5230 = sst [smem:[#allocation56_spill]] %s5174_s9 }
   0xb   :  { %5231 = sst [smem:[#allocation57_spill]] %s5178_s13 }
   0xc   :  { %5232 = sst [smem:[#allocation58_spill]] %s5180_s15 }
   0xd   :  { %5233 = sst [smem:[#allocation59_spill]] %s5189_s24 }
   0xe   :  { %29 = vsyncpa [#allocation3], 0 }
   0xf   :  { %30 = vsyncpa [#allocation6], 0 }
  0x10   :  { %31 = vsyncpa [#allocation9], 0 }
  0x11   :  { %32 = vsyncpa [#allocation12], 0 }
  0x12   :  { %33 = vsyncpa [#allocation15], 0 }
  0x13   :  { %34 = vsyncpa [#allocation18], 0 }
  0x14   :  { %35 = vsyncpa [#allocation21], 0 }
  0x15   :  { %36 = vsyncpa [#allocation24], 0 }
  0x16   :  { %37 = vsyncpa [#allocation27], 0 }
  0x17   :  { %38 = vsyncpa [#allocation4], 0 }
  0x18   :  { %40 = vsyncpa [#allocation4 + $0x1], 0  ;;  %s4362_s5 = smov 0   ;;  %s4364_s26 = smov 0  }
  0x19   :  { %s4366_s27 = smov 0   ;;  %s4368_s28 = smov 0  }
  0x1a LB: > { %5234 = sst [smem:[#allocation39_spill]] %s4193_s5  ;;  %s4383_s6 = sadd.s32 4294967295, %s4205_s28   ;;  %s4205_s28 = sphi %s4368_s28, %s5290_s28   ;;  %s4201_s27 = sphi %s4366_s27, %s5293_s27   ;;  %s4197_s26 = sphi %s4364_s26, %s5292_s26   ;;  %s4193_s5 = sphi %s4362_s5, %s5291_s5  }
  0x1b   : > { %5235 = sst [smem:[#allocation40_spill]] %s4197_s26  ;;  %s2976_s2 = sadd.s32 4294967294, %s4205_s28  }
  0x1c   : > { %5236 = sst [smem:[#allocation41_spill]] %s4201_s27  ;;  %s4387_s29 = sadd.s32 1, %s4205_s28  }
  0x1d   : > { %5237 = sst [smem:[#allocation42_spill]] %s4205_s28  ;;  %s562_s0 = sadd.s32 1, %s4201_s27 }
  0x1e   : > { %5238 = sst [smem:[#allocation43_spill]] %s4387_s29  ;;  %s559_s7 = ssub.s32 %s4205_s28, %s4387_s29 }
  0x1f   : > { %p572_p0 = scmp.ne.s32.totalorder %s4201_s27, %s4197_s26  ;;  %p560_p1 = scmp.eq.s32.totalorder %s559_s7, 0 }
  0x20   : > { %p573_p2 = scmp.eq.s32.totalorder %s4383_s6, 1  ;;  %p578_p3 = scmp.ne.s32.totalorder %s4197_s26, %s4193_s5 }
  0x21   : > { %p579_p4 = scmp.eq.s32.totalorder %s2976_s2, 1  ;;  %p2977_p7 = scmp.ge.s32.totalorder %s4205_s28, 1 }
  0x22   : > { %s4398_s30 = scalar_select %p560_p1, %s4201_s27, %s562_s0  }
  0x23   : > { %p4400_p5 = por %p573_p2, %p572_p0  ;;  %p4404_p6 = por %p579_p4, %p578_p3 }
  0x24   : > { %5239 = sst [smem:[#allocation44_spill]] %s4398_s30  ;;  %p586_p8 = scmp.lt.s32.totalorder %s4205_s28, 3 }
  0x25   : > { %s5240_s3 = scalar_select %p4400_p5, 1, 0 }
  0x26   : > { %s5242_s25 = scalar_select %p4404_p6, 1, 0 }
  0x27   : > { %5241 = sst [smem:[#allocation45_spill]] %s5240_s3  ;;  %p5206_p9 = scmp.eq.s32.totalorder %s4383_s6, 0 }
  0x28   : > { %5243 = sst [smem:[#allocation46_spill]] %s5242_s25  ;;  %p4411_p10 = pnand %p2977_p7, %p586_p8 }
  0x29   : > { %s4207_s4 = smov [#allocation5]   ;;  %s4208_s2 = smov [#allocation8]  }
  0x2a   : > { %s5244_s8 = scalar_select %p4411_p10, 1, 0 }
  0x2b   : > { %s619_s1 = sshll.u32 %s4207_s4, 4  ;;  %p3419_p11 = pneg %p4411_p10  ;;  %s620_s1 = int_to_ptr.vmem [resolvable:$true] %s619_s1 }
  0x2c   : > { %s643_s0 = sshll.u32 %s4208_s2, 4  ;;  %s4209_s30 = smov [#allocation11]   ;;  %s4423_s0 = int_to_ptr.vmem [resolvable:$true] %s643_s0 }
  0x2d   : > { %p4419_p12 = pnand %p5206_p9, %p3419_p11  ;;  %s4425_s27 = sshll.u32 %s4209_s30, 4  ;;  %s673_s27 = int_to_ptr.vmem [resolvable:$true] %s4425_s27 }
  0x2e   : > { %s5246_s5 = sld [smem:[#allocation52_spill]] }
  0x2f   : > { %p4435_p0 = pneg %p4419_p12 }
  0x34   : > { %s5247_s24 = smov %s5246_s5  ;;  %s3659_s4 = scalar_lea.hbm %s5246_s5, 16 }
  0x35   : > { %p3660_p13 = scmp.ne.s32.totalorder %s5247_s24, %s3659_s4  ;;  %p3666_p3 = scmp.lt.u32.totalorder %s3659_s4, %s5247_s24 }
  0x37   : > { %p3662_p1 = pnand %p4435_p0, %p3660_p13 }
  0x39   : > { %p3663_p2 = pneg %p3662_p1 }
  0x3b   : > { %p3668_p4 = pnand %p3666_p3, %p3663_p2 }
  0x3d   : > { %3671 = shalt.err (!%p3668_p4)
}
  0x3e   : > { %s3672_s5 = scalar_lea.vmem %s620_s1, 16  ;;  %s3679_s28 = scalar_lea.vmem %s620_s1, 32 }
  0x3f   : > { %p3673_p7 = scmp.ne.s32.totalorder %s620_s1, %s3672_s5  ;;  %p3680_p9 = scmp.lt.s32.totalorder %s620_s1, %s620_s1 }
  0x40   : > { %p3681_p6 = scmp.lt.s32.totalorder %s3679_s28, %s3672_s5 }
  0x41   : > { %p3675_p8 = pnand %p3673_p7, %p4435_p0 }
  0x42   : > { %p3682_p5 = por %p3681_p6, %p3680_p9 }
  0x43   : > { %p3676_p11 = pneg %p3675_p8 }
  0x45   : > { %p3683_p10 = pnand %p3682_p5, %p3676_p11 }
  0x47   : > { %3686 = shalt.err (!%p3683_p10)
}
  0x48   : > { %3425 = dma.hbm_to_vmem [thread:$0]  (!%p4419_p12), %s5247_s24, 16, %s620_s1, [#allocation6]  }
  0x49   : > { %s5249_s4 = sld [smem:[#allocation55_spill]] }
  0x4f   : > { %s3687_s30 = scalar_lea.hbm %s5249_s4, 32 }
  0x50   : > { %p3688_p13 = scmp.ne.s32.totalorder %s5249_s4, %s3687_s30  ;;  %p3694_p5 = scmp.lt.u32.totalorder %s3687_s30, %s5249_s4 }
  0x52   : > { %p3690_p1 = pnand %p3688_p13, %p4435_p0 }
  0x54   : > { %p3691_p6 = pneg %p3690_p1 }
  0x56   : > { %p3696_p9 = pnand %p3694_p5, %p3691_p6 }
  0x58   : > { %3699 = shalt.err (!%p3696_p9)
}
  0x59   : > { %s3700_s1 = scalar_lea.vmem %s4423_s0, 32  ;;  %p3708_p4 = scmp.lt.s32.totalorder %s4423_s0, %s4423_s0 }
  0x5a   : > { %p3701_p10 = scmp.ne.s32.totalorder %s4423_s0, %s3700_s1  ;;  %p3709_p7 = scmp.lt.s32.totalorder %s3700_s1, %s3700_s1 }
  0x5c   : > { %p3703_p2 = pnand %p3701_p10, %p4435_p0  ;;  %p3710_p8 = por %p3709_p7, %p3708_p4 }
  0x5e   : > { %p3704_p3 = pneg %p3703_p2 }
  0x60   : > { %p3711_p11 = pnand %p3710_p8, %p3704_p3 }
  0x62   : > { %3714 = shalt.err (!%p3711_p11)
}
  0x63   : > { %s5214_s13 = smov 16   ;;  %s4211_s15 = smov 1  }
  0x64   : > { %3431 = dma.hbm_to_vmem [thread:$0]  (!%p4419_p12), %s5249_s4, 32, %s4423_s0, [#allocation9], %s5214_s13, %s5214_s13, %s4211_s15  }
  0x65   : > { %s3715_s30 = scalar_lea.hbm %s5176_s11, 32 }
  0x66   : > { %p3716_p13 = scmp.ne.s32.totalorder %s5176_s11, %s3715_s30  ;;  %p3722_p5 = scmp.lt.u32.totalorder %s3715_s30, %s5176_s11 }
  0x68   : > { %p3718_p1 = pnand %p3716_p13, %p4435_p0 }
  0x6a   : > { %p3719_p6 = pneg %p3718_p1 }
  0x6c   : > { %p3724_p9 = pnand %p3722_p5, %p3719_p6 }
  0x6e   : > { %3727 = shalt.err (!%p3724_p9)
}
  0x6f   : > { %s3728_s29 = scalar_lea.vmem %s673_s27, 32  ;;  %p3736_p4 = scmp.lt.s32.totalorder %s673_s27, %s673_s27 }
  0x70   : > { %p3729_p10 = scmp.ne.s32.totalorder %s673_s27, %s3728_s29  ;;  %p3737_p7 = scmp.lt.s32.totalorder %s3728_s29, %s3728_s29 }
  0x72   : > { %p3731_p2 = pnand %p3729_p10, %p4435_p0  ;;  %p3738_p8 = por %p3737_p7, %p3736_p4 }
  0x74   : > { %p3732_p3 = pneg %p3731_p2 }
  0x76   : > { %p3739_p11 = pnand %p3738_p8, %p3732_p3 }
  0x78   : > { %3742 = shalt.err (!%p3739_p11)
}
  0x79   : > { %3437 = dma.hbm_to_vmem [thread:$0]  (!%p4419_p12), %s5176_s11, 32, %s673_s27, [#allocation12], %s5214_s13, %s5214_s13, %s4211_s15  }
  0x7a   : > { %s4212_s3 = smov [#allocation14]   ;;  %s4213_s25 = smov [#allocation17]  }
  0x7b   : > { %s701_s26 = sshll.u32 %s4212_s3, 4  ;;  %s730_s30 = sshll.u32 %s4213_s25, 4  ;;  %s702_s26 = int_to_ptr.vmem [resolvable:$true] %s701_s26  ;;  %s731_s30 = int_to_ptr.vmem [resolvable:$true] %s730_s30 }
  0x7c   : > { %s3743_s1 = scalar_lea.hbm %s5179_s14, 32 }
  0x7d   : > { %p3744_p13 = scmp.ne.s32.totalorder %s5179_s14, %s3743_s1  ;;  %p3750_p5 = scmp.lt.u32.totalorder %s3743_s1, %s5179_s14 }
  0x7f   : > { %p3746_p1 = pnand %p3744_p13, %p4435_p0 }
  0x81   : > { %p3747_p6 = pneg %p3746_p1 }
  0x83   : > { %p3752_p9 = pnand %p3750_p5, %p3747_p6 }
  0x85   : > { %3755 = shalt.err (!%p3752_p9)
}
  0x86   : > { %s3756_s27 = scalar_lea.vmem %s702_s26, 32  ;;  %p3764_p4 = scmp.lt.s32.totalorder %s702_s26, %s702_s26 }
  0x87   : > { %p3757_p10 = scmp.ne.s32.totalorder %s702_s26, %s3756_s27  ;;  %p3765_p7 = scmp.lt.s32.totalorder %s3756_s27, %s3756_s27 }
  0x89   : > { %p3759_p2 = pnand %p3757_p10, %p4435_p0  ;;  %p3766_p8 = por %p3765_p7, %p3764_p4 }
  0x8b   : > { %p3760_p3 = pneg %p3759_p2 }
  0x8d   : > { %p3767_p11 = pnand %p3766_p8, %p3760_p3 }
  0x8f   : > { %3770 = shalt.err (!%p3767_p11)
}
  0x90   : > { %3443 = dma.hbm_to_vmem [thread:$0]  (!%p4419_p12), %s5179_s14, 32, %s702_s26, [#allocation15], %s5214_s13, %s5214_s13, %s4211_s15  }
  0x91   : > { %s3771_s25 = scalar_lea.hbm %s5182_s17, 32 }
  0x92   : > { %p3772_p13 = scmp.ne.s32.totalorder %s5182_s17, %s3771_s25  ;;  %p3778_p5 = scmp.lt.u32.totalorder %s3771_s25, %s5182_s17 }
  0x94   : > { %p3774_p1 = pnand %p3772_p13, %p4435_p0 }
  0x96   : > { %p3775_p6 = pneg %p3774_p1 }
  0x98   : > { %p3780_p9 = pnand %p3778_p5, %p3775_p6 }
  0x9a   : > { %3783 = shalt.err (!%p3780_p9)
}
  0x9b   : > { %s3784_s24 = scalar_lea.vmem %s731_s30, 32  ;;  %p3792_p4 = scmp.lt.s32.totalorder %s731_s30, %s731_s30 }
  0x9c   : > { %p3785_p10 = scmp.ne.s32.totalorder %s731_s30, %s3784_s24  ;;  %p3793_p7 = scmp.lt.s32.totalorder %s3784_s24, %s3784_s24 }
  0x9e   : > { %p3787_p2 = pnand %p3785_p10, %p4435_p0  ;;  %p3794_p8 = por %p3793_p7, %p3792_p4 }
  0xa0   : > { %p3788_p3 = pneg %p3787_p2 }
  0xa2   : > { %p3795_p11 = pnand %p3794_p8, %p3788_p3 }
  0xa4   : > { %3798 = shalt.err (!%p3795_p11)
}
  0xa5   : > { %3449 = dma.hbm_to_vmem [thread:$0]  (!%p4419_p12), %s5182_s17, 32, %s731_s30, [#allocation18], %s5214_s13, %s5214_s13, %s4211_s15  }
  0xa6   : > { %s4214_s9 = smov [#allocation20]   ;;  %s3799_s25 = scalar_lea.hbm %s5184_s19, 256 }
  0xa7   : > { %s756_s4 = sshll.u32 %s4214_s9, 4  ;;  %p3800_p13 = scmp.ne.s32.totalorder %s5184_s19, %s3799_s25  ;;  %s757_s4 = int_to_ptr.vmem [resolvable:$true] %s756_s4 }
  0xa8   : > { %p3806_p5 = scmp.lt.u32.totalorder %s3799_s25, %s5184_s19 }
  0xa9   : > { %p3802_p1 = pnand %p3800_p13, %p4435_p0 }
  0xab   : > { %p3803_p6 = pneg %p3802_p1 }
  0xad   : > { %p3808_p9 = pnand %p3806_p5, %p3803_p6 }
  0xaf   : > { %3811 = shalt.err (!%p3808_p9)
}
  0xb0   : > { %s3812_s30 = scalar_lea.vmem %s757_s4, 256  ;;  %p3820_p4 = scmp.lt.s32.totalorder %s757_s4, %s757_s4 }
  0xb1   : > { %p3813_p10 = scmp.ne.s32.totalorder %s757_s4, %s3812_s30  ;;  %p3821_p7 = scmp.lt.s32.totalorder %s3812_s30, %s3812_s30 }
  0xb3   : > { %p3815_p2 = pnand %p3813_p10, %p4435_p0  ;;  %p3822_p8 = por %p3821_p7, %p3820_p4 }
  0xb5   : > { %p3816_p3 = pneg %p3815_p2 }
  0xb7   : > { %p3823_p11 = pnand %p3822_p8, %p3816_p3 }
  0xb9   : > { %3826 = shalt.err (!%p3823_p11)
}
  0xba   : > { %s5216_s24 = smov 64   ;;  %s5218_s26 = smov 4  }
  0xbb   : > { %3455 = dma.hbm_to_vmem [thread:$0]  (!%p4419_p12), %s5184_s19, 256, %s757_s4, [#allocation21], %s5216_s24, %s5216_s24, %s5218_s26  }
  0xbc   : > { %s4217_s0 = smov [#allocation23]   ;;  %s4218_s25 = smov [#allocation2]  }
  0xbd   : > { %s783_s3 = sshll.u32 %s4217_s0, 4  ;;  %s602_s5 = sshll.u32 %s4218_s25, 4  ;;  %s784_s3 = int_to_ptr.vmem [resolvable:$true] %s783_s3  ;;  %s4562_s5 = int_to_ptr.vmem [resolvable:$true] %s602_s5 }
  0xbe   : > { %s3827_s29 = scalar_lea.hbm %s5186_s21, 16 }
  0xbf   : > { %p3828_p13 = scmp.ne.s32.totalorder %s5186_s21, %s3827_s29  ;;  %p3834_p5 = scmp.lt.u32.totalorder %s3827_s29, %s5186_s21 }
  0xc1   : > { %p3830_p1 = pnand %p3828_p13, %p4435_p0 }
  0xc3   : > { %p3831_p6 = pneg %p3830_p1 }
  0xc5   : > { %p3836_p9 = pnand %p3834_p5, %p3831_p6 }
  0xc7   : > { %3839 = shalt.err (!%p3836_p9)
}
  0xc8   : > { %s3840_s9 = scalar_lea.vmem %s784_s3, 16  ;;  %s3847_s0 = scalar_lea.vmem %s784_s3, 32 }
  0xc9   : > { %p3841_p10 = scmp.ne.s32.totalorder %s784_s3, %s3840_s9  ;;  %p3848_p4 = scmp.lt.s32.totalorder %s784_s3, %s784_s3 }
  0xca   : > { %p3849_p7 = scmp.lt.s32.totalorder %s3847_s0, %s3840_s9 }
  0xcb   : > { %p3843_p2 = pnand %p3841_p10, %p4435_p0 }
  0xcc   : > { %p3850_p8 = por %p3849_p7, %p3848_p4 }
  0xcd   : > { %p3844_p3 = pneg %p3843_p2 }
  0xcf   : > { %p3851_p11 = pnand %p3850_p8, %p3844_p3 }
  0xd1   : > { %3854 = shalt.err (!%p3851_p11)
}
  0xd2   : > { %3461 = dma.hbm_to_vmem [thread:$0]  (!%p4419_p12), %s5186_s21, 16, %s784_s3, [#allocation24]  }
  0xd3   : > { %s5250_s29 = sld [smem:[#allocation49_spill]] }
  0xd9   : > { %s3855_s30 = scalar_lea.hbm %s5250_s29, 16 }
  0xda   : > { %p3856_p13 = scmp.ne.s32.totalorder %s5250_s29, %s3855_s30  ;;  %p3862_p5 = scmp.lt.u32.totalorder %s3855_s30, %s5250_s29 }
  0xdc   : > { %p3858_p1 = pnand %p3856_p13, %p4435_p0 }
  0xde   : > { %p3859_p6 = pneg %p3858_p1 }
  0xe0   : > { %p3864_p9 = pnand %p3862_p5, %p3859_p6 }
  0xe2   : > { %3867 = shalt.err (!%p3864_p9)
}
  0xe3   : > { %s3868_s3 = scalar_lea.vmem %s4562_s5, 16  ;;  %s3875_s13 = scalar_lea.vmem %s4562_s5, 32 }
  0xe4   : > { %p3869_p10 = scmp.ne.s32.totalorder %s4562_s5, %s3868_s3  ;;  %p3876_p4 = scmp.lt.s32.totalorder %s4562_s5, %s4562_s5 }
  0xe5   : > { %p3877_p7 = scmp.lt.s32.totalorder %s3875_s13, %s3868_s3 }
  0xe6   : > { %p3871_p2 = pnand %p3869_p10, %p4435_p0 }
  0xe7   : > { %p3878_p8 = por %p3877_p7, %p3876_p4 }
  0xe8   : > { %p3872_p3 = pneg %p3871_p2 }
  0xea   : > { %p3879_p11 = pnand %p3878_p8, %p3872_p3 }
  0xec   : > { %3882 = shalt.err (!%p3879_p11)
}
  0xed   : > { %3422 = dma.hbm_to_vmem [thread:$0]  (!%p4419_p12), %s5250_s29, 16, %s4562_s5, [#allocation3]  }
  0xee   : > { %s4219_s1 = smov [#allocation7]   ;;  %s4220_s27 = smov [#allocation10]  }
  0xef   : > { %s630_s30 = sshll.u32 %s4219_s1, 4  ;;  %s659_s4 = sshll.u32 %s4220_s27, 4  ;;  %s631_s30 = int_to_ptr.vmem [resolvable:$true] %s630_s30  ;;  %s4606_s4 = int_to_ptr.vmem [resolvable:$true] %s659_s4 }
  0xf0   : > { %s5251_s3 = sld [smem:[#allocation53_spill]] }
  0xf6   : > { %s3883_s13 = scalar_lea.hbm %s5251_s3, 16 }
  0xf7   : > { %p3884_p13 = scmp.ne.s32.totalorder %s5251_s3, %s3883_s13  ;;  %p3890_p5 = scmp.lt.u32.totalorder %s3883_s13, %s5251_s3 }
  0xf9   : > { %p3886_p1 = pnand %p3884_p13, %p4435_p0 }
  0xfb   : > { %p3887_p6 = pneg %p3886_p1 }
  0xfd   : > { %p3892_p9 = pnand %p3890_p5, %p3887_p6 }
  0xff   : > { %3895 = shalt.err (!%p3892_p9)
}
 0x100   : > { %s3896_s28 = scalar_lea.vmem %s631_s30, 16  ;;  %s3903_s1 = scalar_lea.vmem %s631_s30, 32 }
 0x101   : > { %p3897_p10 = scmp.ne.s32.totalorder %s631_s30, %s3896_s28  ;;  %p3904_p4 = scmp.lt.s32.totalorder %s631_s30, %s631_s30 }
 0x102   : > { %p3905_p7 = scmp.lt.s32.totalorder %s3903_s1, %s3896_s28 }
 0x103   : > { %p3899_p2 = pnand %p3897_p10, %p4435_p0 }
 0x104   : > { %p3906_p8 = por %p3905_p7, %p3904_p4 }
 0x105   : > { %p3900_p3 = pneg %p3899_p2 }
 0x107   : > { %p3907_p11 = pnand %p3906_p8, %p3900_p3 }
 0x109   : > { %3910 = shalt.err (!%p3907_p11)
}
 0x10a   : > { %3428 = dma.hbm_to_vmem [thread:$0]  (!%p4419_p12), %s5251_s3, 16, %s631_s30, [#allocation6]  }
 0x10b   : > { %s3911_s0 = scalar_lea.hbm %s5175_s10, 32 }
 0x10c   : > { %p3912_p13 = scmp.ne.s32.totalorder %s5175_s10, %s3911_s0  ;;  %p3918_p5 = scmp.lt.u32.totalorder %s3911_s0, %s5175_s10 }
 0x10e   : > { %p3914_p1 = pnand %p3912_p13, %p4435_p0 }
 0x110   : > { %p3915_p6 = pneg %p3914_p1 }
 0x112   : > { %p3920_p9 = pnand %p3918_p5, %p3915_p6 }
 0x114   : > { %3923 = shalt.err (!%p3920_p9)
}
 0x115   : > { %s3924_s30 = scalar_lea.vmem %s4606_s4, 32  ;;  %p3932_p4 = scmp.lt.s32.totalorder %s4606_s4, %s4606_s4 }
 0x116   : > { %p3925_p10 = scmp.ne.s32.totalorder %s4606_s4, %s3924_s30  ;;  %p3933_p7 = scmp.lt.s32.totalorder %s3924_s30, %s3924_s30 }
 0x118   : > { %p3927_p2 = pnand %p3925_p10, %p4435_p0  ;;  %p3934_p8 = por %p3933_p7, %p3932_p4 }
 0x11a   : > { %p3928_p3 = pneg %p3927_p2 }
 0x11c   : > { %p3935_p11 = pnand %p3934_p8, %p3928_p3 }
 0x11e   : > { %3938 = shalt.err (!%p3935_p11)
}
 0x11f   : > { %s5252_s1 = smov 16   ;;  %s4221_s27 = smov [#allocation13]  }
 0x120   : > { %3434 = dma.hbm_to_vmem [thread:$0]  (!%p4419_p12), %s5175_s10, 32, %s4606_s4, [#allocation9], %s5252_s1, %s5252_s1, %s4211_s15  }
 0x121   : > { %s685_s9 = sshll.u32 %s4221_s27, 4  ;;  %s4222_s0 = smov [#allocation16]   ;;  %s686_s9 = int_to_ptr.vmem [resolvable:$true] %s685_s9 }
 0x122   : > { %s717_s13 = sshll.u32 %s4222_s0, 4  ;;  %s3939_s28 = scalar_lea.hbm %s5177_s12, 32  ;;  %s4652_s13 = int_to_ptr.vmem [resolvable:$true] %s717_s13 }
 0x123   : > { %p3940_p13 = scmp.ne.s32.totalorder %s5177_s12, %s3939_s28  ;;  %p3946_p5 = scmp.lt.u32.totalorder %s3939_s28, %s5177_s12 }
 0x125   : > { %p3942_p1 = pnand %p3940_p13, %p4435_p0 }
 0x127   : > { %p3943_p6 = pneg %p3942_p1 }
 0x129   : > { %p3948_p9 = pnand %p3946_p5, %p3943_p6 }
 0x12b   : > { %3951 = shalt.err (!%p3948_p9)
}
 0x12c   : > { %s3952_s26 = scalar_lea.vmem %s686_s9, 32  ;;  %p3960_p4 = scmp.lt.s32.totalorder %s686_s9, %s686_s9 }
 0x12d   : > { %p3953_p10 = scmp.ne.s32.totalorder %s686_s9, %s3952_s26  ;;  %p3961_p7 = scmp.lt.s32.totalorder %s3952_s26, %s3952_s26 }
 0x12f   : > { %p3955_p2 = pnand %p3953_p10, %p4435_p0  ;;  %p3962_p8 = por %p3961_p7, %p3960_p4 }
 0x131   : > { %p3956_p3 = pneg %p3955_p2 }
 0x133   : > { %p3963_p11 = pnand %p3962_p8, %p3956_p3 }
 0x135   : > { %3966 = shalt.err (!%p3963_p11)
}
 0x136   : > { %3440 = dma.hbm_to_vmem [thread:$0]  (!%p4419_p12), %s5177_s12, 32, %s686_s9, [#allocation12], %s5252_s1, %s5252_s1, %s4211_s15  }
 0x137   : > { %s3967_s5 = scalar_lea.hbm %s5181_s16, 32 }
 0x138   : > { %p3968_p13 = scmp.ne.s32.totalorder %s5181_s16, %s3967_s5  ;;  %p3974_p5 = scmp.lt.u32.totalorder %s3967_s5, %s5181_s16 }
 0x13a   : > { %p3970_p1 = pnand %p3968_p13, %p4435_p0 }
 0x13c   : > { %p3971_p6 = pneg %p3970_p1 }
 0x13e   : > { %p3976_p9 = pnand %p3974_p5, %p3971_p6 }
 0x140   : > { %3979 = shalt.err (!%p3976_p9)
}
 0x141   : > { %s3980_s9 = scalar_lea.vmem %s4652_s13, 32  ;;  %p3988_p4 = scmp.lt.s32.totalorder %s4652_s13, %s4652_s13 }
 0x142   : > { %p3981_p10 = scmp.ne.s32.totalorder %s4652_s13, %s3980_s9  ;;  %p3989_p7 = scmp.lt.s32.totalorder %s3980_s9, %s3980_s9 }
 0x144   : > { %p3983_p2 = pnand %p3981_p10, %p4435_p0  ;;  %p3990_p8 = por %p3989_p7, %p3988_p4 }
 0x146   : > { %p3984_p3 = pneg %p3983_p2 }
 0x148   : > { %p3991_p11 = pnand %p3990_p8, %p3984_p3 }
 0x14a   : > { %3994 = shalt.err (!%p3991_p11)
}
 0x14b   : > { %3446 = dma.hbm_to_vmem [thread:$0]  (!%p4419_p12), %s5181_s16, 32, %s4652_s13, [#allocation15], %s5252_s1, %s5252_s1, %s4211_s15  }
 0x14c   : > { %s4223_s27 = smov [#allocation19]   ;;  %s4224_s25 = smov [#allocation22]  }
 0x14d   : > { %s743_s0 = sshll.u32 %s4223_s27, 4  ;;  %s769_s5 = sshll.u32 %s4224_s25, 4  ;;  %s744_s0 = int_to_ptr.vmem [resolvable:$true] %s743_s0  ;;  %s4701_s5 = int_to_ptr.vmem [resolvable:$true] %s769_s5 }
 0x14e   : > { %s3995_s24 = scalar_lea.hbm %s5183_s18, 32 }
 0x14f   : > { %p3996_p13 = scmp.ne.s32.totalorder %s5183_s18, %s3995_s24  ;;  %p4002_p5 = scmp.lt.u32.totalorder %s3995_s24, %s5183_s18 }
 0x151   : > { %p3998_p1 = pnand %p3996_p13, %p4435_p0 }
 0x153   : > { %p3999_p6 = pneg %p3998_p1 }
 0x155   : > { %p4004_p9 = pnand %p4002_p5, %p3999_p6 }
 0x157   : > { %4007 = shalt.err (!%p4004_p9)
}
 0x158   : > { %s4008_s3 = scalar_lea.vmem %s744_s0, 32  ;;  %p4016_p4 = scmp.lt.s32.totalorder %s744_s0, %s744_s0 }
 0x159   : > { %p4009_p10 = scmp.ne.s32.totalorder %s744_s0, %s4008_s3  ;;  %p4017_p7 = scmp.lt.s32.totalorder %s4008_s3, %s4008_s3 }
 0x15b   : > { %p4011_p2 = pnand %p4009_p10, %p4435_p0  ;;  %p4018_p8 = por %p4017_p7, %p4016_p4 }
 0x15d   : > { %p4012_p3 = pneg %p4011_p2 }
 0x15f   : > { %p4019_p11 = pnand %p4018_p8, %p4012_p3 }
 0x161   : > { %4022 = shalt.err (!%p4019_p11)
}
 0x162   : > { %3452 = dma.hbm_to_vmem [thread:$0]  (!%p4419_p12), %s5183_s18, 32, %s744_s0, [#allocation18], %s5252_s1, %s5252_s1, %s4211_s15  }
 0x163   : > { %s4023_s24 = scalar_lea.hbm %s5185_s20, 128 }
 0x164   : > { %p4024_p13 = scmp.ne.s32.totalorder %s5185_s20, %s4023_s24  ;;  %p4030_p5 = scmp.lt.u32.totalorder %s4023_s24, %s5185_s20 }
 0x166   : > { %p4026_p1 = pnand %p4024_p13, %p4435_p0 }
 0x168   : > { %p4027_p6 = pneg %p4026_p1 }
 0x16a   : > { %p4032_p9 = pnand %p4030_p5, %p4027_p6 }
 0x16c   : > { %4035 = shalt.err (!%p4032_p9)
}
 0x16d   : > { %s4036_s15 = scalar_lea.vmem %s4701_s5, 128  ;;  %p4044_p4 = scmp.lt.s32.totalorder %s4701_s5, %s4701_s5 }
 0x16e   : > { %p4037_p10 = scmp.ne.s32.totalorder %s4701_s5, %s4036_s15  ;;  %p4045_p7 = scmp.lt.s32.totalorder %s4036_s15, %s4036_s15 }
 0x170   : > { %p4039_p2 = pnand %p4037_p10, %p4435_p0  ;;  %p4046_p8 = por %p4045_p7, %p4044_p4 }
 0x172   : > { %p4040_p3 = pneg %p4039_p2 }
 0x174   : > { %p4047_p11 = pnand %p4046_p8, %p4040_p3 }
 0x176   : > { %4050 = shalt.err (!%p4047_p11)
}
 0x177   : > { %s5253_s1 = smov 4   ;;  %s5254_s0 = smov 64  }
 0x178   : > { %3458 = dma.hbm_to_vmem [thread:$0]  (!%p4419_p12), %s5185_s20, 128, %s4701_s5, [#allocation21], %s5254_s0, %s5254_s0, %s5253_s1  }
 0x179   : > { %s4225_s25 = smov [#allocation25]   ;;  %s4226_s30 = smov [#allocation26]  }
 0x17a   : > { %s793_s28 = sshll.u32 %s4225_s25, 4  ;;  %s807_s24 = sshll.u32 %s4226_s30, 4  ;;  %s794_s28 = int_to_ptr.vmem [resolvable:$true] %s793_s28  ;;  %s4750_s24 = int_to_ptr.vmem [resolvable:$true] %s807_s24 }
 0x17b   : > { %s4051_s26 = scalar_lea.hbm %s5187_s22, 512 }
 0x17c   : > { %p4052_p13 = scmp.ne.s32.totalorder %s5187_s22, %s4051_s26  ;;  %p4058_p5 = scmp.lt.u32.totalorder %s4051_s26, %s5187_s22 }
 0x17e   : > { %p4054_p1 = pnand %p4052_p13, %p4435_p0 }
 0x180   : > { %p4055_p6 = pneg %p4054_p1 }
 0x182   : > { %p4060_p9 = pnand %p4058_p5, %p4055_p6 }
 0x184   : > { %4063 = shalt.err (!%p4060_p9)
}
 0x185   : > { %s4064_s27 = scalar_lea.vmem %s794_s28, 512  ;;  %p4072_p4 = scmp.lt.s32.totalorder %s794_s28, %s794_s28 }
 0x186   : > { %p4065_p10 = scmp.ne.s32.totalorder %s794_s28, %s4064_s27  ;;  %p4073_p7 = scmp.lt.s32.totalorder %s4064_s27, %s4064_s27 }
 0x188   : > { %p4067_p2 = pnand %p4065_p10, %p4435_p0  ;;  %p4074_p8 = por %p4073_p7, %p4072_p4 }
 0x18a   : > { %p4068_p3 = pneg %p4067_p2 }
 0x18c   : > { %p4075_p11 = pnand %p4074_p8, %p4068_p3 }
 0x18e   : > { %4078 = shalt.err (!%p4075_p11)
}
 0x18f   : > { %3464 = dma.hbm_to_vmem [thread:$0]  (!%p4419_p12), %s5187_s22, 512, %s794_s28, [#allocation24], %s5254_s0, %s5254_s0, %s5253_s1  }
 0x190   : > { %s4079_s26 = scalar_lea.hbm %s5188_s23, 16 }
 0x191   : > { %p4080_p13 = scmp.ne.s32.totalorder %s5188_s23, %s4079_s26  ;;  %p4086_p5 = scmp.lt.u32.totalorder %s4079_s26, %s5188_s23 }
 0x193   : > { %p4082_p1 = pnand %p4080_p13, %p4435_p0 }
 0x195   : > { %p4083_p6 = pneg %p4082_p1 }
 0x197   : > { %p4088_p9 = pnand %p4086_p5, %p4083_p6 }
 0x199   : > { %4091 = shalt.err (!%p4088_p9)
}
 0x19a   : > { %s4092_s1 = scalar_lea.vmem %s4750_s24, 16  ;;  %s4099_s0 = scalar_lea.vmem %s4750_s24, 32 }
 0x19b   : > { %p4093_p10 = scmp.ne.s32.totalorder %s4750_s24, %s4092_s1  ;;  %p4100_p4 = scmp.lt.s32.totalorder %s4750_s24, %s4750_s24 }
 0x19c   : > { %p4101_p7 = scmp.lt.s32.totalorder %s4099_s0, %s4092_s1 }
 0x19d   : > { %p4095_p2 = pnand %p4093_p10, %p4435_p0 }
 0x19e   : > { %p4102_p8 = por %p4101_p7, %p4100_p4 }
 0x19f   : > { %p4096_p3 = pneg %p4095_p2 }
 0x1a1   : > { %p4103_p11 = pnand %p4102_p8, %p4096_p3 }
 0x1a3   : > { %4106 = shalt.err (!%p4103_p11)
}
 0x1a4   : > { %3467 = dma.hbm_to_vmem [thread:$0]  (!%p4419_p12), %s5188_s23, 16, %s4750_s24, [#allocation27]  }
 0x1a5   : > { %p5255_p13 = scmp.ne.s32.totalorder %s5244_s8, 0 }
 0x1a6   : > { %p5256_p0 = scmp.eq.s32.totalorder (!%p5255_p13), %s4383_s6, 0 }
 0x1a7   : > { %826 = sbr.rel (%p5255_p13) target bundleno = 9323 (0x246b), region = 116 }
 0x1ae   : > { %4152 = dma.done.wait (%p5256_p0), [#allocation3], 16   ;;  %p5257_p1 = pmov %p5256_p0 }
 0x1af   : > { %p5258_p6 = pmov %p5256_p0 }
 0x1b0   : > { %4154 = vsyncadd (%p5257_p1), [#allocation3], 4294967280 }
 0x1b1   : > { %4156 = dma.done.wait (%p5258_p6), [#allocation6], 32   ;;  %p5259_p5 = pmov %p5256_p0 }
 0x1b2   : > { %p5260_p9 = pmov %p5256_p0 }
 0x1b3   : > { %4158 = vsyncadd (%p5259_p5), [#allocation6], 4294967264 }
 0x1b4   : > { %4160 = dma.done.wait (%p5260_p9), [#allocation9], 64   ;;  %p5261_p12 = pmov %p5256_p0 }
 0x1b5   : > { %p5262_p10 = pmov %p5256_p0 }
 0x1b6   : > { %4162 = vsyncadd (%p5261_p12), [#allocation9], 4294967232 }
 0x1b7   : > { %4164 = dma.done.wait (%p5262_p10), [#allocation12], 64   ;;  %p5263_p2 = pmov %p5256_p0 }
 0x1b8   : > { %p5264_p3 = pmov %p5256_p0 }
 0x1b9   : > { %4166 = vsyncadd (%p5263_p2), [#allocation12], 4294967232 }
 0x1ba   : > { %4168 = dma.done.wait (%p5264_p3), [#allocation15], 64   ;;  %p5265_p4 = pmov %p5256_p0 }
 0x1bb   : > { %p5266_p7 = pmov %p5256_p0 }
 0x1bc   : > { %4170 = vsyncadd (%p5265_p4), [#allocation15], 4294967232 }
 0x1bd   : > { %4172 = dma.done.wait (%p5266_p7), [#allocation18], 64   ;;  %p5267_p8 = pmov %p5256_p0 }
 0x1be   : > { %p5268_p11 = pmov %p5256_p0 }
 0x1bf   : > { %4174 = vsyncadd (%p5267_p8), [#allocation18], 4294967232 }
 0x1c0   : > { %4176 = dma.done.wait (%p5268_p11), [#allocation21], 384   ;;  %p5269_p13 = pmov %p5256_p0 }
 0x1c2   : > { %4178 = vsyncadd (%p5269_p13), [#allocation21], 4294966912 }
 0x1c3   : > { %4180 = dma.done.wait (%p5256_p0), [#allocation24], 528   ;;  %p5270_p1 = pmov %p5256_p0 }
 0x1c4   : > { %p5271_p6 = pmov %p5256_p0 }
 0x1c5   : > { %4182 = vsyncadd (%p5270_p1), [#allocation24], 4294966768 }
 0x1c6   : > { %4184 = dma.done.wait (%p5271_p6), [#allocation27], 16   ;;  %p5272_p5 = pmov %p5256_p0 }
 0x1c7   : > { %v4227_v0 = vmov 0.0   ;;  %vm4228_vm0 = vmmov 0   ;;  %p949_p9 = scmp.lt.s32.totalorder %s4383_s6, 1  ;;  %s5273_s2 = sld [smem:[#allocation48_spill]]  ;;  %vm988_vm1 = vcmask 523264   ;;  %vm1045_vm2 = vcmask 1040384  }
 0x1c8   : > { %4186 = vsyncadd (%p5272_p5), [#allocation27], 4294967280  ;;  %3177 = vmatprep.subr.bf16.mxu0 %v4227_v0  ;;  %3185 = vmatprep.mubr.msk.bf16.mxu0 %vm4228_vm0, %v4227_v0  ;;  %s5274_s15 = sld [smem:[#allocation47_spill]]  ;;  %v963_v7 = vld [vmem:[#allocation2] sm:$0x1]  ;;  %s4229_s0 = smov 32  }
 0x1c9   : > { %3189 = vmatprep.subr.bf16.mxu1 %v4227_v0  ;;  %3193 = vmatprep.mubr.msk.bf16.mxu1 %vm4228_vm0, %v4227_v0  ;;  %s950_s24 = scalar_select %p949_p9, %s4383_s6, 1  ;;  %vm1047_vm3 = vcmask 1041408   ;;  %vm1049_vm4 = vcmask 1042432   ;;  %vm1063_vm5 = vcmask 257024   ;;  %v3018_v38 = vld [vmem:[#allocation5] ss:$0 sm:$0xff] }
 0x1ca   : > { %s4230_s28 = smov 96   ;;  %s4231_s27 = smov 64   ;;  %v3019_v40 = vld [vmem:[#allocation7] ss:$0 sm:$0xff]  ;;  %vm1116_vm6 = vcmask 261120   ;;  %vm1169_vm7 = vcmask 130048  }
 0x1cb   : > { %s5276_s4 = sld [smem:[#allocation51_spill]]  ;;  %s5277_s13 = sld [smem:[#allocation54_spill]]  ;;  %v3020_v44 = vld [vmem:[#allocation8] ss:$0 sm:$0xff]  ;;  %vm1267_vm8 = vcmask 27648   ;;  %vm1294_vm9 = vcmask 31744  }
 0x1cc   : > { %s4232_s5 = smov 112   ;;  %s5278_s7 = sld [smem:[#allocation56_spill]]  ;;  %vm2675_vm10 = vcmask 392192   ;;  %vm2754_vm11 = vcmask 516096  }
 0x1cd   : > { %v3566_v1 = vld [vmem:[%s5273_s2] sm:$0xff]   ;;  %v3567_v2 = vld [vmem:[%s5273_s2 + $0x8] sm:$0xff]   ;;  %v3568_v3 = vld [vmem:[%s5273_s2 + $0x10] sm:$0xff]   ;;  %s4233_s30 = smov 16   ;;  %s5279_s26 = sld [smem:[#allocation57_spill]] }
 0x1ce   : > { %3178 = vmatpush3.bf16.msra.mxu0 %v3566_v1  ;;  %s951_s3 = scalar_lea.vmem %s5274_s15, %s950_s24  ;;  %v3569_v4 = vld [vmem:[%s5273_s2 + $0x18] sm:$0xff]   ;;  %s5275_s24 = sld [smem:[#allocation50_spill]] }
 0x1cf   : > { %3179 = vmatprep.subr.bf16.mxu0 %v4227_v0  ;;  %v953_v5 = vld [vmem:[%s951_s3] sm:$0x1]  ;;  %s5281_s25 = sld [smem:[#allocation58_spill]]  ;;  %s3109_s3 = sshll.u32 %s4383_s6, 4 }
 0x1d0   : > { %v954_v6 = vpack.c.bf16 %v953_v5, %v953_v5 }
 0x1d1   : > { %v3017_v23 = vld [vmem:[%s5276_s4] ss:$0 sm:$0xff]  ;;  %v3571_v33 = vld [vmem:[%s5277_s13 + $0x8] sm:$0xff]   ;;  %s5284_s4 = sld [smem:[#allocation59_spill]] }
 0x1d2   : > { %3180 = vmatpush3.bf16.msra.mxu0 %v3567_v2  ;;  %v3570_v32 = vld [vmem:[%s5277_s13] sm:$0xff]  }
 0x1d3   : > { %3181 = vmatprep.subr.bf16.mxu0 %v4227_v0  ;;  %3190 = vmatpush3.bf16.msra.mxu1 %v3570_v32  ;;  %s5280_s15 = smov %s5279_s26 }
 0x1d4   : > { %v1051_v19 = vld [vmem:[%s5275_s24] sm:$0xf]  ;;  %3191 = vmatprep.subr.bf16.mxu1 %v4227_v0 }
 0x1d6   : > { %3182 = vmatpush3.bf16.msra.mxu0 %v3568_v3 }
 0x1d7   : > { %3183 = vmatprep.subr.bf16.mxu0 %v4227_v0  ;;  %3192 = vmatpush3.bf16.msra.mxu1 %v3571_v33  ;;  %s5123_s9 = scalar_lea.hbm %s5284_s4, %s3109_s3 }
 0x1d8   : > { %3197 = vmatprep.subr.bf16.mxu1 %v4227_v0 }
 0x1da   : > { %3184 = vmatpush3.bf16.msra.mxu0 %v3569_v4 }
 0x1db   : > { %3203 = vmatprep.subr.bf16.mxu0 %v4227_v0 }
 0x1dd   : > { %3186 = vmatmul.mubr.msk.bf16.vlgmr.msra.gmra.mrb[0].mxu0 %vm988_vm1, %v954_v6 }
 0x1de   : > { %3205 = vmatprep.mubr.msk.bf16.mxu0 %vm4228_vm0, %v4227_v0 }
 0x2b0   : > { %v1026_v8 = vpop.f32.mrb[0].mxu0 }
 0x2b1   : > { %v1027_v9 = vadd.f32 %v1026_v8, %v963_v7  ;;  %v3187_v10 = vpop.f32.mrb[1].mxu0 }
 0x2b2   : > { %v1029_v11 = vpop.f32.mrb[2].mxu0 }
 0x2b3   : > { %v3188_v12 = vpop.f32.mrb[3].mxu0  ;;  %v1041_v13 = vrot.slane %v1027_v9, 5  ;;  %v1033_v14 = vrot.slane %v1027_v9, 7  ;;  %v1037_v15 = vrot.slane %v1027_v9, 6 }
 0x2b5   : > { %1042 = vrot.lane.b32.xlu1 %v1041_v13, %s4229_s0  ;;  %1034 = vrot.lane.b32.xlu0 %v1033_v14, %s4230_s28 }
 0x2b9   : > { %1038 = vrot.lane.b32.xlu0 %v1037_v15, %s4231_s27 }
 0x327   : > { %v1035_v16 = vpop.permute.xlu0 %1034  ;;  %v1043_v20 = vpop.permute.xlu1 %1042 }
 0x328   : > { %v1046_v17 = vsel %vm1045_vm2, %v1027_v9, %v1035_v16 }
 0x32b   : > { %v1039_v18 = vpop.permute.xlu0 %1038 }
 0x32c   : > { %v1048_v21 = vsel %vm1047_vm3, %v1046_v17, %v1039_v18 }
 0x32d   : > { %v1050_v22 = vsel %vm1049_vm4, %v1048_v21, %v1043_v20 }
 0x32e   : > { %v1052_v24 = vadd.f32 %v1051_v19, %v1050_v22 }
 0x330   : > { %v1060_v25 = vadd.f32 %v3017_v23, %v1052_v24 }
 0x332   : > { %v1064_v26 = vsel %vm1063_vm5, %v1060_v25, 0.0 }
 0x333   : > { %1065 = vadd.xlane.f32.xlu1 %v1064_v26 }
 0x3c0   : > { %v1066_v27 = vpop.xlane.xlu1 %1065 }
 0x3c1   : > { %v1068_v28 = vmul.f32 0.03125, %v1066_v27 }
 0x3c3   : > { %v1069_v29 = vsub.f32 %v1060_v25, %v1068_v28  ;;  %v3572_v28 = vld [vmem:[%s5278_s7] sm:$0xff]  }
 0x3c5   : > { %v1070_v30 = vmul.f32 %v1069_v29, %v1069_v29 }
 0x3c7   : > { %v1071_v31 = vsel %vm1063_vm5, %v1070_v30, 0.0 }
 0x3c8   : > { %1072 = vadd.xlane.f32.xlu0 %v1071_v31 }
 0x455   : > { %v1073_v34 = vpop.xlane.xlu0 %1072 }
 0x456   : > { %v1074_v35 = vmul.f32 0.03125, %v1073_v34 }
 0x458   : > { %v1075_v36 = vadd.f32 1e-12, %v1074_v35 }
 0x45a   : > { %3597 = vrsqrt.f32 %v1075_v36 }
 0x464   : > { %v3598_v37 = vpop.eup %3597 }
 0x465   : > { %v1077_v39 = vmul.f32 %v3598_v37, %v1069_v29  ;;  %v3573_v29 = vld [vmem:[%s5278_s7 + $0x8] sm:$0xff]  }
 0x467   : > { %v1084_v41 = vmul.f32 %v3018_v38, %v1077_v39 }
 0x469   : > { %v4885_v42 = vadd.f32 %v3019_v40, %v1084_v41  ;;  %v3028_v41 = vld [vmem:[#allocation10] ss:$0 sm:$0xff] }
 0x46b   : > { %v1092_v43 = vpack.c.bf16 %v4885_v42, %v4885_v42 }
 0x46d   : > { %3194 = vmatmul.mubr.msk.bf16.vlgmr.msra.gmra.mrb[0].mxu1 %vm1116_vm6, %v1092_v43 }
 0x46e   : > { %3199 = vmatprep.mubr.msk.bf16.mxu1 %vm4228_vm0, %v4227_v0 }
 0x540   : > { %v1154_v45 = vpop.f32.mrb[0].mxu1 }
 0x541   : > { %v1155_v46 = vadd.f32 %v3020_v44, %v1154_v45  ;;  %v3195_v47 = vpop.f32.mrb[1].mxu1 }
 0x542   : > { %v1157_v48 = vpop.f32.mrb[2].mxu1 }
 0x543   : > { %1161 = vrot.lane.b32.xlu0 %v1155_v46, %s4232_s5  ;;  %v3196_v49 = vpop.f32.mrb[3].mxu1  ;;  %v1164_v52 = vpack.c.bf16 %v1155_v46, %v1155_v46 }
 0x5b5   : > { %v1162_v50 = vpop.permute.xlu0 %1161 }
 0x5b6   : > { %v1165_v51 = vpack.c.bf16 %v1162_v50, %v1162_v50 }
 0x5b8   : > { %1217 = vrot.lane.b32.xlu1 %v1165_v51, %s4230_s28 }
 0x5bc   : > { %1167 = vrot.lane.b32.xlu1 %v1164_v52, %s4230_s28 }
 0x62a   : > { %v1218_v53 = vpop.permute.xlu1 %1217 }
 0x62b   : > { %v1223_v54 = vsel %vm1169_vm7, %v1218_v53, 0 }
 0x62c   : > { %3204 = vmatpush3.bf16.xpose.msra.mxu0 %v1223_v54 }
 0x62d   : > { %3215 = vmatprep.subr.bf16.mxu0 %v4227_v0 }
 0x62e   : > { %v1168_v55 = vpop.permute.xlu1 %1167 }
 0x62f   : > { %v1174_v56 = vsel %vm1169_vm7, %v1168_v55, 0  ;;  %v3574_v55 = vld [vmem:[%s5279_s26] sm:$0xff]  }
 0x630   : > { %3198 = vmatpush3.bf16.xpose.msra.mxu1 %v1174_v56 }
 0x631   : > { %3209 = vmatprep.subr.bf16.mxu1 %v4227_v0 }
 0x633   : > { %3206 = vmatmul.mubr.msk.bf16.vlgmr.msra.gmra.mrb[4].mxu0 %vm1169_vm7, %v1165_v51 }
 0x634   : > { %3217 = vmatprep.mubr.msk.bf16.mxu0 %vm4228_vm0, %v4227_v0 }
 0x637   : > { %3200 = vmatmul.mubr.msk.bf16.vlgmr.msra.gmra.mrb[4].mxu1 %vm1169_vm7, %v1164_v52 }
 0x638   : > { %3211 = vmatprep.mubr.msk.bf16.mxu1 %vm4228_vm0, %v4227_v0 }
 0x706   : > { %v1259_v57 = vpop.f32.mrb[4].mxu0 }
 0x707   : > { %v1266_v58 = vmul.f32 0.25, %v1259_v57  ;;  %v3207_v59 = vpop.f32.mrb[5].mxu0 }
 0x708   : > { %v1262_v60 = vpop.f32.mrb[6].mxu0 }
 0x709   : > { %v3208_v61 = vpop.f32.mrb[7].mxu0  ;;  %v1271_v62 = vsel %vm1267_vm8, %v1266_v58, -inf  ;;  %v3032_v60 = vld [vmem:[#allocation11] ss:$0 sm:$0xff] }
 0x70a   : > { %v1210_v63 = vpop.f32.mrb[4].mxu1  ;;  %1272 = vmax.xlane.f32.xlu0 %v1271_v62  ;;  %v3033_v62 = vld [vmem:[#allocation13] ss:$0 sm:$0xff] }
 0x70b   : > { %v1265_v1 = vmul.f32 0.25, %v1210_v63  ;;  %v3201_v2 = vpop.f32.mrb[5].mxu1 }
 0x70c   : > { %v1213_v3 = vpop.f32.mrb[6].mxu1 }
 0x70d   : > { %v3202_v4 = vpop.f32.mrb[7].mxu1  ;;  %v1268_v5 = vsel %vm1267_vm8, %v1265_v1, -inf  ;;  %v3576_v3 = vld [vmem:[%s5281_s25] sm:$0xff]  }
 0x70e   : > { %1269 = vmax.xlane.f32.xlu1 %v1268_v5  ;;  %v3577_v4 = vld [vmem:[%s5281_s25 + $0x8] sm:$0xff]   ;;  %v3578_v5 = vld [vmem:[%s5281_s25 + $0x10] sm:$0xff]  }
 0x797   : > { %v1273_v6 = vpop.xlane.xlu0 %1272 }
 0x798   : > { %v1275_v7 = vsub.f32 %v1266_v58, %v1273_v6  ;;  %v3579_v6 = vld [vmem:[%s5281_s25 + $0x18] sm:$0xff]  }
 0x79a   : > { %v1278_v8 = vmul.f32 1.442695, %v1275_v7  ;;  %v3034_v7 = vld [vmem:[#allocation14] ss:$0 sm:$0xff] }
 0x79b   : > { %v1270_v9 = vpop.xlane.xlu1 %1269 }
 0x79c   : > { %3599 = vpow2.f32 %v1278_v8  ;;  %v1274_v10 = vsub.f32 %v1265_v1, %v1270_v9 }
 0x79e   : > { %v1276_v11 = vmul.f32 1.442695, %v1274_v10 }
 0x7a0   : > { %3601 = vpow2.f32 %v1276_v11 }
 0x7a6   : > { %v3600_v12 = vpop.eup %3599 }
 0x7a7   : > { %v1283_v13 = vsel %vm1267_vm8, %v3600_v12, 0.0 }
 0x7a8   : > { %1284 = vadd.xlane.f32.xlu0 %v1283_v13 }
 0x7aa   : > { %v3602_v14 = vpop.eup %3601 }
 0x7ab   : > { %v1280_v15 = vsel %vm1267_vm8, %v3602_v14, 0.0 }
 0x7ac   : > { %1281 = vadd.xlane.f32.xlu1 %v1280_v15 }
 0x7bd   : > { %1292 = vrot.lane.b32.xlu1 %v1164_v52, %s4231_s27 }
 0x7be   : > { %1341 = vrot.lane.b32.xlu0 %v1165_v51, %s4231_s27 }
 0x835   : > { %v1285_v16 = vpop.xlane.xlu0 %1284 }
 0x836   : > { %3603 = vrcp.f32 %v1285_v16 }
 0x839   : > { %v1282_v17 = vpop.xlane.xlu1 %1281  ;;  %v1342_v18 = vpop.permute.xlu0 %1341 }
 0x83a   : > { %3605 = vrcp.f32 %v1282_v17  ;;  %v1347_v19 = vsel %vm1047_vm3, %v1342_v18, 0 }
 0x83b   : > { %3216 = vmatpush3.bf16.msra.mxu0 %v1347_v19 }
 0x83c   : > { %3229 = vmatprep.subr.bf16.mxu0 %v4227_v0 }
 0x83d   : > { %v1293_v20 = vpop.permute.xlu1 %1292 }
 0x83e   : > { %v1299_v21 = vsel %vm1047_vm3, %v1293_v20, 0 }
 0x83f   : > { %3210 = vmatpush3.bf16.msra.mxu1 %v1299_v21 }
 0x840   : > { %v3604_v22 = vpop.eup %3603  ;;  %3221 = vmatprep.subr.bf16.mxu1 %v4227_v0 }
 0x841   : > { %v1289_v23 = vmul.f32 %v3604_v22, %v3600_v12 }
 0x843   : > { %v1291_v24 = vpack.c.bf16 %v1289_v23, %v1289_v23  ;;  %v3038_v23 = vld [vmem:[#allocation16] ss:$0 sm:$0xff] }
 0x844   : > { %v3606_v25 = vpop.eup %3605 }
 0x845   : > { %v1288_v26 = vmul.f32 %v3606_v25, %v3602_v14  ;;  %3218 = vmatmul.mubr.msk.bf16.vlgmr.msra.gmra.mrb[8].mxu0 %vm1294_vm9, %v1291_v24 }
 0x846   : > { %3233 = vmatprep.mubr.msk.bf16.mxu0 %vm4228_vm0, %v4227_v0  ;;  %3230 = vmatpush3.bf16.msra.mxu0 %v3574_v55 }
 0x847   : > { %v1290_v27 = vpack.c.bf16 %v1288_v26, %v1288_v26  ;;  %3231 = vmatprep.subr.bf16.mxu0 %v4227_v0 }
 0x849   : > { %3212 = vmatmul.mubr.msk.bf16.vlgmr.msra.gmra.mrb[8].mxu1 %vm1294_vm9, %v1290_v27 }
 0x84a   : > { %3225 = vmatprep.mubr.msk.bf16.mxu1 %vm4228_vm0, %v4227_v0  ;;  %3222 = vmatpush3.bf16.msra.mxu1 %v3572_v28 }
 0x84b   : > { %3223 = vmatprep.subr.bf16.mxu1 %v4227_v0 }
 0x84e   : > { %3224 = vmatpush3.bf16.msra.mxu1 %v3573_v29 }
 0x84f   : > { %3237 = vmatprep.subr.bf16.mxu1 %v4227_v0 }
 0x918   : > { %v1383_v30 = vpop.f32.mrb[8].mxu0 }
 0x919   : > { %1390 = vrot.lane.b32.xlu0 %v1383_v30, %s4233_s30  ;;  %v3219_v31 = vpop.f32.mrb[9].mxu0 }
 0x91a   : > { %v1386_v32 = vpop.f32.mrb[10].mxu0 }
 0x91b   : > { %v3220_v33 = vpop.f32.mrb[11].mxu0 }
 0x91c   : > { %v1335_v34 = vpop.f32.mrb[8].mxu1 }
 0x91d   : > { %v3213_v35 = vpop.f32.mrb[9].mxu1 }
 0x91e   : > { %v1338_v36 = vpop.f32.mrb[10].mxu1 }
 0x91f   : > { %v3214_v37 = vpop.f32.mrb[11].mxu1  ;;  %v3580_v36 = vld [vmem:[%s5277_s13 + $0x10] sm:$0xff]  }
 0x920   : > { %v3581_v37 = vld [vmem:[%s5277_s13 + $0x18] sm:$0xff]  }
 0x98b   : > { %v1391_v38 = vpop.permute.xlu0 %1390 }
 0x98c   : > { %v1393_v39 = vsel %vm1169_vm7, %v1335_v34, %v1391_v38 }
 0x98d   : > { %v1394_v40 = vpack.c.bf16 %v1393_v39, %v1393_v39 }
 0x98f   : > { %3226 = vmatmul.mubr.msk.bf16.vlgmr.msra.gmra.mrb[12].mxu1 %vm1116_vm6, %v1394_v40 }
 0x990   : > { %3245 = vmatprep.mubr.msk.bf16.mxu1 %vm4228_vm0, %v4227_v0  ;;  %3238 = vmatpush3.bf16.msra.mxu1 %v3576_v3 }
 0x991   : > { %3239 = vmatprep.subr.bf16.mxu1 %v4227_v0 }
 0x994   : > { %3240 = vmatpush3.bf16.msra.mxu1 %v3577_v4 }
 0x995   : > { %3241 = vmatprep.subr.bf16.mxu1 %v4227_v0 }
 0x998   : > { %3242 = vmatpush3.bf16.msra.mxu1 %v3578_v5 }
 0x999   : > { %3243 = vmatprep.subr.bf16.mxu1 %v4227_v0 }
 0x99c   : > { %3244 = vmatpush3.bf16.msra.mxu1 %v3579_v6 }
 0x99d   : > { %3263 = vmatprep.subr.bf16.mxu1 %v4227_v0 }
 0xa62   : > { %v1455_v43 = vpop.f32.mrb[12].mxu1 }
 0xa63   : > { %v1456_v44 = vadd.f32 %v3028_v41, %v1455_v43  ;;  %v3227_v45 = vpop.f32.mrb[13].mxu1  ;;  %v3044_v43 = vld [vmem:[#allocation17] ss:$0 sm:$0xff] }
 0xa64   : > { %v1458_v46 = vpop.f32.mrb[14].mxu1  ;;  %v3045_v45 = vld [vmem:[#allocation19] ss:$0 sm:$0xff] }
 0xa65   : > { %v3228_v47 = vpop.f32.mrb[15].mxu1  ;;  %v1461_v48 = vadd.f32 %v1456_v44, %v4885_v42  ;;  %v3575_v42 = vld [vmem:[%s5280_s15 + $0x8] sm:$0xff]  }
 0xa66   : > { %3232 = vmatpush3.bf16.msra.mxu0 %v3575_v42 }
 0xa67   : > { %v1464_v49 = vsel %vm1063_vm5, %v1461_v48, 0.0  ;;  %3249 = vmatprep.subr.bf16.mxu0 %v4227_v0 }
 0xa68   : > { %1465 = vadd.xlane.f32.xlu1 %v1464_v49  ;;  %v3050_v49 = vld [vmem:[#allocation8 + $0x1] ss:$0 sm:$0xff] }
 0xaf5   : > { %v1466_v50 = vpop.xlane.xlu1 %1465 }
 0xaf6   : > { %v1467_v51 = vmul.f32 0.03125, %v1466_v50 }
 0xaf8   : > { %v1468_v52 = vsub.f32 %v1461_v48, %v1467_v51 }
 0xafa   : > { %v1469_v53 = vmul.f32 %v1468_v52, %v1468_v52 }
 0xafc   : > { %v1470_v54 = vsel %vm1063_vm5, %v1469_v53, 0.0 }
 0xafd   : > { %1471 = vadd.xlane.f32.xlu0 %v1470_v54 }
 0xb8a   : > { %v1472_v56 = vpop.xlane.xlu0 %1471 }
 0xb8b   : > { %v1473_v57 = vmul.f32 0.03125, %v1472_v56 }
 0xb8d   : > { %v1474_v58 = vadd.f32 1e-12, %v1473_v57 }
 0xb8f   : > { %3607 = vrsqrt.f32 %v1474_v58 }
 0xb99   : > { %v3608_v59 = vpop.eup %3607 }
 0xb9a   : > { %v1476_v61 = vmul.f32 %v3608_v59, %v1468_v52 }
 0xb9c   : > { %v1483_v63 = vmul.f32 %v3032_v60, %v1476_v61 }
 0xb9e   : > { %v1490_v1 = vadd.f32 %v3033_v62, %v1483_v63 }
 0xba0   : > { %v1491_v2 = vpack.c.bf16 %v1490_v1, %v1490_v1 }
 0xba2   : > { %3234 = vmatmul.mubr.msk.bf16.vlgmr.msra.gmra.mrb[12].mxu0 %vm1116_vm6, %v1491_v2 }
 0xba3   : > { %3253 = vmatprep.mubr.msk.bf16.mxu0 %vm4228_vm0, %v4227_v0  ;;  %3250 = vmatpush3.bf16.msra.mxu0 %v3580_v36 }
 0xba4   : > { %3251 = vmatprep.subr.bf16.mxu0 %v4227_v0 }
 0xba7   : > { %3252 = vmatpush3.bf16.msra.mxu0 %v3581_v37 }
 0xba8   : > { %3257 = vmatprep.subr.bf16.mxu0 %v4227_v0 }
 0xc75   : > { %v1552_v8 = vpop.f32.mrb[12].mxu0 }
 0xc76   : > { %v1553_v9 = vadd.f32 %v3034_v7, %v1552_v8  ;;  %v3235_v10 = vpop.f32.mrb[13].mxu0 }
 0xc77   : > { %v1555_v11 = vpop.f32.mrb[14].mxu0 }
 0xc78   : > { %v1558_v12 = vmul.f32 %v1553_v9, %v1553_v9  ;;  %v3236_v13 = vpop.f32.mrb[15].mxu0 }
 0xc7a   : > { %v1559_v14 = vmul.f32 %v1558_v12, %v1553_v9 }
 0xc7c   : > { %v1560_v15 = vmul.f32 0.044715, %v1559_v14 }
 0xc7e   : > { %v1561_v16 = vadd.f32 %v1560_v15, %v1553_v9 }
 0xc80   : > { %v1562_v17 = vmul.f32 0.7978846, %v1561_v16 }
 0xc82   : > { %3609 = vtanh.f32 %v1562_v17 }
 0xc8c   : > { %v3610_v18 = vpop.eup %3609 }
 0xc8d   : > { %v1564_v19 = vadd.f32 1.0, %v3610_v18 }
 0xc8f   : > { %v1565_v20 = vmul.f32 0.5, %v1564_v19 }
 0xc91   : > { %v1566_v21 = vmul.f32 %v1565_v20, %v1553_v9 }
 0xc93   : > { %v1567_v22 = vpack.c.bf16 %v1566_v21, %v1566_v21 }
 0xc95   : > { %3246 = vmatmul.mubr.msk.bf16.vlgmr.msra.gmra.mrb[16].mxu1 %vm988_vm1, %v1567_v22 }
 0xc96   : > { %3265 = vmatprep.mubr.msk.bf16.mxu1 %vm4228_vm0, %v4227_v0 }
 0xd68   : > { %v1644_v24 = vpop.f32.mrb[16].mxu1 }
 0xd69   : > { %v1645_v25 = vadd.f32 %v3038_v23, %v1644_v24  ;;  %v3247_v26 = vpop.f32.mrb[17].mxu1 }
 0xd6a   : > { %v1647_v27 = vpop.f32.mrb[18].mxu1 }
 0xd6b   : > { %v3248_v28 = vpop.f32.mrb[19].mxu1  ;;  %v1650_v29 = vadd.f32 %v1645_v25, %v1490_v1 }
 0xd6d   : > { %v1653_v30 = vsel %vm1063_vm5, %v1650_v29, 0.0 }
 0xd6e   : > { %1654 = vadd.xlane.f32.xlu0 %v1653_v30 }
 0xdfb   : > { %v1655_v31 = vpop.xlane.xlu0 %1654 }
 0xdfc   : > { %v1656_v32 = vmul.f32 0.03125, %v1655_v31 }
 0xdfe   : > { %v1657_v33 = vsub.f32 %v1650_v29, %v1656_v32  ;;  %v3582_v32 = vld [vmem:[%s5278_s7 + $0x10] sm:$0xff]  }
 0xe00   : > { %v1658_v34 = vmul.f32 %v1657_v33, %v1657_v33 }
 0xe02   : > { %v1659_v35 = vsel %vm1063_vm5, %v1658_v34, 0.0 }
 0xe03   : > { %1660 = vadd.xlane.f32.xlu1 %v1659_v35 }
 0xe90   : > { %v1661_v38 = vpop.xlane.xlu1 %1660 }
 0xe91   : > { %v1662_v39 = vmul.f32 0.03125, %v1661_v38 }
 0xe93   : > { %v1663_v40 = vadd.f32 1e-12, %v1662_v39 }
 0xe95   : > { %3611 = vrsqrt.f32 %v1663_v40 }
 0xe9f   : > { %v3612_v41 = vpop.eup %3611 }
 0xea0   : > { %v1665_v44 = vmul.f32 %v3612_v41, %v1657_v33  ;;  %v3583_v33 = vld [vmem:[%s5278_s7 + $0x18] sm:$0xff]  }
 0xea2   : > { %v1672_v46 = vmul.f32 %v3044_v43, %v1665_v44 }
 0xea4   : > { %v4977_v47 = vadd.f32 %v3045_v45, %v1672_v46  ;;  %v3062_v46 = vld [vmem:[#allocation10 + $0x1] ss:$0 sm:$0xff] }
 0xea6   : > { %v1680_v48 = vpack.c.bf16 %v4977_v47, %v4977_v47 }
 0xea8   : > { %3254 = vmatmul.mubr.msk.bf16.vlgmr.msra.gmra.mrb[16].mxu0 %vm1116_vm6, %v1680_v48 }
 0xea9   : > { %3259 = vmatprep.mubr.msk.bf16.mxu0 %vm4228_vm0, %v4227_v0 }
 0xf7b   : > { %v1743_v50 = vpop.f32.mrb[16].mxu0 }
 0xf7c   : > { %v1744_v51 = vadd.f32 %v3050_v49, %v1743_v50  ;;  %v3255_v52 = vpop.f32.mrb[17].mxu0 }
 0xf7d   : > { %v1746_v53 = vpop.f32.mrb[18].mxu0 }
 0xf7e   : > { %1750 = vrot.lane.b32.xlu0 %v1744_v51, %s4232_s5  ;;  %v3256_v54 = vpop.f32.mrb[19].mxu0  ;;  %v1753_v56 = vpack.c.bf16 %v1744_v51, %v1744_v51 }
 0xff0   : > { %v1751_v55 = vpop.permute.xlu0 %1750 }
 0xff1   : > { %v1754_v42 = vpack.c.bf16 %v1751_v55, %v1751_v55 }
 0xff3   : > { %1805 = vrot.lane.b32.xlu1 %v1754_v42, %s4230_s28 }
 0xff7   : > { %1756 = vrot.lane.b32.xlu1 %v1753_v56, %s4230_s28 }
0x1065   : > { %v1806_v57 = vpop.permute.xlu1 %1805 }
0x1066   : > { %v1811_v58 = vsel %vm1169_vm7, %v1806_v57, 0 }
0x1067   : > { %3264 = vmatpush3.bf16.xpose.msra.mxu1 %v1811_v58 }
0x1068   : > { %3275 = vmatprep.subr.bf16.mxu1 %v4227_v0 }
0x1069   : > { %v1757_v59 = vpop.permute.xlu1 %1756 }
0x106a   : > { %v1762_v60 = vsel %vm1169_vm7, %v1757_v59, 0  ;;  %v3584_v59 = vld [vmem:[%s5280_s15 + $0x10] sm:$0xff]  }
0x106b   : > { %3258 = vmatpush3.bf16.xpose.msra.mxu0 %v1762_v60 }
0x106c   : > { %3269 = vmatprep.subr.bf16.mxu0 %v4227_v0 }
0x106e   : > { %3266 = vmatmul.mubr.msk.bf16.vlgmr.msra.gmra.mrb[20].mxu1 %vm1169_vm7, %v1754_v42 }
0x106f   : > { %3277 = vmatprep.mubr.msk.bf16.mxu1 %vm4228_vm0, %v4227_v0 }
0x1072   : > { %3260 = vmatmul.mubr.msk.bf16.vlgmr.msra.gmra.mrb[20].mxu0 %vm1169_vm7, %v1753_v56 }
0x1073   : > { %3271 = vmatprep.mubr.msk.bf16.mxu0 %vm4228_vm0, %v4227_v0 }
0x1141   : > { %v1847_v61 = vpop.f32.mrb[20].mxu1 }
0x1142   : > { %v1854_v62 = vmul.f32 0.25, %v1847_v61  ;;  %v3267_v63 = vpop.f32.mrb[21].mxu1 }
0x1143   : > { %v1850_v1 = vpop.f32.mrb[22].mxu1 }
0x1144   : > { %v3268_v2 = vpop.f32.mrb[23].mxu1  ;;  %v1858_v3 = vsel %vm1267_vm8, %v1854_v62, -inf  ;;  %v3066_v1 = vld [vmem:[#allocation11 + $0x1] ss:$0 sm:$0xff] }
0x1145   : > { %1859 = vmax.xlane.f32.xlu0 %v1858_v3  ;;  %v1798_v4 = vpop.f32.mrb[20].mxu0  ;;  %v3067_v3 = vld [vmem:[#allocation13 + $0x1] ss:$0 sm:$0xff] }
0x1146   : > { %v1853_v5 = vmul.f32 0.25, %v1798_v4  ;;  %v3261_v6 = vpop.f32.mrb[21].mxu0 }
0x1147   : > { %v1801_v7 = vpop.f32.mrb[22].mxu0 }
0x1148   : > { %v3262_v8 = vpop.f32.mrb[23].mxu0  ;;  %v1855_v9 = vsel %vm1267_vm8, %v1853_v5, -inf  ;;  %v3586_v7 = vld [vmem:[%s5281_s25 + $0x20] sm:$0xff]  }
0x1149   : > { %1856 = vmax.xlane.f32.xlu1 %v1855_v9  ;;  %v3587_v8 = vld [vmem:[%s5281_s25 + $0x28] sm:$0xff]   ;;  %v3588_v9 = vld [vmem:[%s5281_s25 + $0x30] sm:$0xff]  }
0x11d2   : > { %v1860_v10 = vpop.xlane.xlu0 %1859 }
0x11d3   : > { %v1862_v11 = vsub.f32 %v1854_v62, %v1860_v10  ;;  %v3589_v10 = vld [vmem:[%s5281_s25 + $0x38] sm:$0xff]  }
0x11d5   : > { %v1865_v12 = vmul.f32 1.442695, %v1862_v11  ;;  %v3072_v11 = vld [vmem:[#allocation14 + $0x1] ss:$0 sm:$0xff] }
0x11d6   : > { %v1857_v13 = vpop.xlane.xlu1 %1856 }
0x11d7   : > { %3613 = vpow2.f32 %v1865_v12  ;;  %v1861_v14 = vsub.f32 %v1853_v5, %v1857_v13 }
0x11d9   : > { %v1863_v15 = vmul.f32 1.442695, %v1861_v14 }
0x11db   : > { %3615 = vpow2.f32 %v1863_v15 }
0x11e1   : > { %v3614_v16 = vpop.eup %3613 }
0x11e2   : > { %v1870_v17 = vsel %vm1267_vm8, %v3614_v16, 0.0 }
0x11e3   : > { %1871 = vadd.xlane.f32.xlu0 %v1870_v17 }
0x11e5   : > { %v3616_v18 = vpop.eup %3615 }
0x11e6   : > { %v1867_v19 = vsel %vm1267_vm8, %v3616_v18, 0.0 }
0x11e7   : > { %1868 = vadd.xlane.f32.xlu1 %v1867_v19 }
0x11f8   : > { %1879 = vrot.lane.b32.xlu1 %v1753_v56, %s4231_s27 }
0x11f9   : > { %1927 = vrot.lane.b32.xlu0 %v1754_v42, %s4231_s27  ;;  %s4235_s27 = smov 80  }
0x1270   : > { %v1872_v20 = vpop.xlane.xlu0 %1871 }
0x1271   : > { %3617 = vrcp.f32 %v1872_v20 }
0x1274   : > { %v1928_v21 = vpop.permute.xlu0 %1927  ;;  %v1869_v22 = vpop.xlane.xlu1 %1868 }
0x1275   : > { %v1933_v23 = vsel %vm1047_vm3, %v1928_v21, 0  ;;  %3619 = vrcp.f32 %v1869_v22 }
0x1276   : > { %3276 = vmatpush3.bf16.msra.mxu1 %v1933_v23 }
0x1277   : > { %3289 = vmatprep.subr.bf16.mxu1 %v4227_v0 }
0x1278   : > { %v1880_v24 = vpop.permute.xlu1 %1879 }
0x1279   : > { %v1885_v25 = vsel %vm1047_vm3, %v1880_v24, 0 }
0x127a   : > { %3270 = vmatpush3.bf16.msra.mxu0 %v1885_v25 }
0x127b   : > { %v3618_v26 = vpop.eup %3617  ;;  %3281 = vmatprep.subr.bf16.mxu0 %v4227_v0 }
0x127c   : > { %v1876_v27 = vmul.f32 %v3618_v26, %v3614_v16 }
0x127e   : > { %v1878_v28 = vpack.c.bf16 %v1876_v27, %v1876_v27  ;;  %v3084_v27 = vld [vmem:[#allocation16 + $0x1] ss:$0 sm:$0xff] }
0x127f   : > { %v3620_v29 = vpop.eup %3619 }
0x1280   : > { %v1875_v30 = vmul.f32 %v3620_v29, %v3616_v18  ;;  %3278 = vmatmul.mubr.msk.bf16.vlgmr.msra.gmra.mrb[24].mxu1 %vm1294_vm9, %v1878_v28 }
0x1281   : > { %3293 = vmatprep.mubr.msk.bf16.mxu1 %vm4228_vm0, %v4227_v0  ;;  %3290 = vmatpush3.bf16.msra.mxu1 %v3584_v59  ;;  %v3092_v59 = vld [vmem:[#allocation23] ss:$0 sm:$0xff] }
0x1282   : > { %v1877_v31 = vpack.c.bf16 %v1875_v30, %v1875_v30  ;;  %3291 = vmatprep.subr.bf16.mxu1 %v4227_v0 }
0x1284   : > { %3272 = vmatmul.mubr.msk.bf16.vlgmr.msra.gmra.mrb[24].mxu0 %vm1294_vm9, %v1877_v31 }
0x1285   : > { %3285 = vmatprep.mubr.msk.bf16.mxu0 %vm4228_vm0, %v4227_v0  ;;  %3282 = vmatpush3.bf16.msra.mxu0 %v3582_v32 }
0x1286   : > { %3283 = vmatprep.subr.bf16.mxu0 %v4227_v0 }
0x1289   : > { %3284 = vmatpush3.bf16.msra.mxu0 %v3583_v33 }
0x128a   : > { %3297 = vmatprep.subr.bf16.mxu0 %v4227_v0 }
0x1353   : > { %v1969_v34 = vpop.f32.mrb[24].mxu1 }
0x1354   : > { %1976 = vrot.lane.b32.xlu0 %v1969_v34, %s4233_s30  ;;  %v3279_v35 = vpop.f32.mrb[25].mxu1 }
0x1355   : > { %v1972_v36 = vpop.f32.mrb[26].mxu1 }
0x1356   : > { %v3280_v37 = vpop.f32.mrb[27].mxu1 }
0x1357   : > { %v1921_v38 = vpop.f32.mrb[24].mxu0 }
0x1358   : > { %v3273_v39 = vpop.f32.mrb[25].mxu0 }
0x1359   : > { %v1924_v40 = vpop.f32.mrb[26].mxu0 }
0x135a   : > { %v3274_v41 = vpop.f32.mrb[27].mxu0  ;;  %v3590_v40 = vld [vmem:[#allocation20] sm:$0xff]  }
0x135b   : > { %v3591_v41 = vld [vmem:[#allocation20 + $0x8] sm:$0xff]  }
0x13c6   : > { %v1977_v43 = vpop.permute.xlu0 %1976 }
0x13c7   : > { %v1979_v44 = vsel %vm1169_vm7, %v1921_v38, %v1977_v43  ;;  %v3592_v43 = vld [vmem:[#allocation22] sm:$0xff]  }
0x13c8   : > { %v1980_v45 = vpack.c.bf16 %v1979_v44, %v1979_v44 }
0x13ca   : > { %3286 = vmatmul.mubr.msk.bf16.vlgmr.msra.gmra.mrb[28].mxu0 %vm1116_vm6, %v1980_v45 }
0x13cb   : > { %3305 = vmatprep.mubr.msk.bf16.mxu0 %vm4228_vm0, %v4227_v0  ;;  %3298 = vmatpush3.bf16.msra.mxu0 %v3586_v7 }
0x13cc   : > { %3299 = vmatprep.subr.bf16.mxu0 %v4227_v0 }
0x13cf   : > { %3300 = vmatpush3.bf16.msra.mxu0 %v3587_v8 }
0x13d0   : > { %3301 = vmatprep.subr.bf16.mxu0 %v4227_v0 }
0x13d3   : > { %3302 = vmatpush3.bf16.msra.mxu0 %v3588_v9 }
0x13d4   : > { %3303 = vmatprep.subr.bf16.mxu0 %v4227_v0 }
0x13d7   : > { %3304 = vmatpush3.bf16.msra.mxu0 %v3589_v10 }
0x13d8   : > { %3323 = vmatprep.subr.bf16.mxu0 %v4227_v0 }
0x149d   : > { %v2043_v48 = vpop.f32.mrb[28].mxu0 }
0x149e   : > { %v2044_v49 = vadd.f32 %v3062_v46, %v2043_v48  ;;  %v3287_v50 = vpop.f32.mrb[29].mxu0 }
0x149f   : > { %v2046_v51 = vpop.f32.mrb[30].mxu0 }
0x14a0   : > { %v3288_v52 = vpop.f32.mrb[31].mxu0  ;;  %v2049_v53 = vadd.f32 %v2044_v49, %v4977_v47  ;;  %v3585_v47 = vld [vmem:[%s5280_s15 + $0x18] sm:$0xff]   ;;  %v3090_v49 = vld [vmem:[#allocation17 + $0x1] ss:$0 sm:$0xff]  ;;  %v3091_v51 = vld [vmem:[#allocation19 + $0x1] ss:$0 sm:$0xff] }
0x14a1   : > { %3292 = vmatpush3.bf16.msra.mxu1 %v3585_v47 }
0x14a2   : > { %v2054_v54 = vsel %vm1063_vm5, %v2049_v53, 0.0  ;;  %3309 = vmatprep.subr.bf16.mxu1 %v4227_v0 }
0x14a3   : > { %2055 = vadd.xlane.f32.xlu1 %v2054_v54 }
0x1530   : > { %v2056_v55 = vpop.xlane.xlu1 %2055 }
0x1531   : > { %v2057_v42 = vmul.f32 0.03125, %v2056_v55  ;;  %v4234_v55 = vmov 0  }
0x1533   : > { %v2058_v56 = vsub.f32 %v2049_v53, %v2057_v42 }
0x1535   : > { %v2059_v57 = vmul.f32 %v2058_v56, %v2058_v56 }
0x1537   : > { %v2060_v58 = vsel %vm1063_vm5, %v2059_v57, 0.0 }
0x1538   : > { %2061 = vadd.xlane.f32.xlu0 %v2060_v58 }
0x15c5   : > { %v2062_v60 = vpop.xlane.xlu0 %2061 }
0x15c6   : > { %v2063_v61 = vmul.f32 0.03125, %v2062_v60 }
0x15c8   : > { %v2064_v62 = vadd.f32 1e-12, %v2063_v61 }
0x15ca   : > { %3621 = vrsqrt.f32 %v2064_v62 }
0x15d4   : > { %v3622_v63 = vpop.eup %3621 }
0x15d5   : > { %v2066_v2 = vmul.f32 %v3622_v63, %v2058_v56 }
0x15d7   : > { %v2073_v4 = vmul.f32 %v3066_v1, %v2066_v2 }
0x15d9   : > { %v2080_v5 = vadd.f32 %v3067_v3, %v2073_v4 }
0x15db   : > { %v2081_v6 = vpack.c.bf16 %v2080_v5, %v2080_v5 }
0x15dd   : > { %3294 = vmatmul.mubr.msk.bf16.vlgmr.msra.gmra.mrb[28].mxu1 %vm1116_vm6, %v2081_v6 }
0x15de   : > { %3313 = vmatprep.mubr.msk.bf16.mxu1 %vm4228_vm0, %v4227_v0  ;;  %3310 = vmatpush3.bf16.msra.mxu1 %v3590_v40 }
0x15df   : > { %3311 = vmatprep.subr.bf16.mxu1 %v4227_v0 }
0x15e2   : > { %3312 = vmatpush3.bf16.msra.mxu1 %v3591_v41 }
0x15e3   : > { %3317 = vmatprep.subr.bf16.mxu1 %v4227_v0 }
0x16b0   : > { %v2144_v12 = vpop.f32.mrb[28].mxu1 }
0x16b1   : > { %v2145_v13 = vadd.f32 %v3072_v11, %v2144_v12  ;;  %v3295_v14 = vpop.f32.mrb[29].mxu1 }
0x16b2   : > { %v2147_v15 = vpop.f32.mrb[30].mxu1 }
0x16b3   : > { %v2150_v16 = vmul.f32 %v2145_v13, %v2145_v13  ;;  %v3296_v17 = vpop.f32.mrb[31].mxu1 }
0x16b5   : > { %v2151_v18 = vmul.f32 %v2150_v16, %v2145_v13 }
0x16b7   : > { %v2152_v19 = vmul.f32 0.044715, %v2151_v18 }
0x16b9   : > { %v2153_v20 = vadd.f32 %v2152_v19, %v2145_v13 }
0x16bb   : > { %v2154_v21 = vmul.f32 0.7978846, %v2153_v20 }
0x16bd   : > { %3623 = vtanh.f32 %v2154_v21 }
0x16c7   : > { %v3624_v22 = vpop.eup %3623 }
0x16c8   : > { %v2156_v23 = vadd.f32 1.0, %v3624_v22 }
0x16ca   : > { %v2157_v24 = vmul.f32 0.5, %v2156_v23 }
0x16cc   : > { %v2158_v25 = vmul.f32 %v2157_v24, %v2145_v13 }
0x16ce   : > { %v2159_v26 = vpack.c.bf16 %v2158_v25, %v2158_v25 }
0x16d0   : > { %3306 = vmatmul.mubr.msk.bf16.vlgmr.msra.gmra.mrb[32].mxu0 %vm988_vm1, %v2159_v26 }
0x16d1   : > { %3325 = vmatprep.mubr.msk.bf16.mxu0 %vm4228_vm0, %v4227_v0  ;;  %3324 = vmatpush3.bf16.msra.mxu0 %v3592_v43 }
0x16d2   : > { %3335 = vmatprep.subr.bf16.mxu0 %v4227_v0 }
0x17a3   : > { %v2238_v28 = vpop.f32.mrb[32].mxu0 }
0x17a4   : > { %v2239_v29 = vadd.f32 %v3084_v27, %v2238_v28  ;;  %v3307_v30 = vpop.f32.mrb[33].mxu0 }
0x17a5   : > { %v2241_v31 = vpop.f32.mrb[34].mxu0 }
0x17a6   : > { %v3308_v32 = vpop.f32.mrb[35].mxu0  ;;  %v2244_v33 = vadd.f32 %v2239_v29, %v2080_v5 }
0x17a8   : > { %v2249_v34 = vsel %vm1063_vm5, %v2244_v33, 0.0 }
0x17a9   : > { %2250 = vadd.xlane.f32.xlu0 %v2249_v34 }
0x1836   : > { %v2251_v35 = vpop.xlane.xlu0 %2250 }
0x1837   : > { %v2252_v36 = vmul.f32 0.03125, %v2251_v35 }
0x1839   : > { %v2253_v37 = vsub.f32 %v2244_v33, %v2252_v36 }
0x183b   : > { %v2254_v38 = vmul.f32 %v2253_v37, %v2253_v37 }
0x183d   : > { %v2255_v39 = vsel %vm1063_vm5, %v2254_v38, 0.0 }
0x183e   : > { %2256 = vadd.xlane.f32.xlu1 %v2255_v39 }
0x18cb   : > { %v2257_v44 = vpop.xlane.xlu1 %2256 }
0x18cc   : > { %v2258_v45 = vmul.f32 0.03125, %v2257_v44 }
0x18ce   : > { %v2259_v46 = vadd.f32 1e-12, %v2258_v45 }
0x18d0   : > { %3625 = vrsqrt.f32 %v2259_v46 }
0x18da   : > { %v3626_v48 = vpop.eup %3625 }
0x18db   : > { %v2261_v50 = vmul.f32 %v3626_v48, %v2253_v37 }
0x18dd   : > { %v2268_v52 = vmul.f32 %v3090_v49, %v2261_v50 }
0x18df   : > { %v2275_v53 = vadd.f32 %v3091_v51, %v2268_v52 }
0x18e1   : > { %v2276_v54 = vpack.c.bf16 %v2275_v53, %v2275_v53 }
0x18e3   : > { %3314 = vmatmul.mubr.msk.bf16.vlgmr.msra.gmra.mrb[32].mxu1 %vm1116_vm6, %v2276_v54 }
0x18e4   : > { %3318 = vmatpush3.bf16.msra.mxu1 %v3592_v43  ;;  %3319 = vmatprep.mubr.msk.bf16.mxu1 %vm4228_vm0, %v4227_v0 }
0x18e5   : > { %3329 = vmatprep.subr.bf16.mxu1 %v4227_v0 }
0x18eb   : > { %3320 = vmatmul.mubr.bf16.vlgmr.msra.gmra.mrb[36].mxu1 %v4234_v55 }
0x18ec   : > { %3330 = vmatpush3.bf16.msra.mxu1 %v3592_v43  ;;  %3331 = vmatprep.mubr.msk.bf16.mxu1 %vm4228_vm0, %v4227_v0 }
0x18ed   : > { %3341 = vmatprep.subr.bf16.mxu1 %v4227_v0 }
0x19b6   : > { %v2337_v42 = vpop.f32.mrb[32].mxu1 }
0x19b7   : > { %v3315_v56 = vpop.f32.mrb[33].mxu1  ;;  %v5071_v47 = vadd.f32 %v3092_v59, %v2337_v42 }
0x19b8   : > { %v2340_v57 = vpop.f32.mrb[34].mxu1 }
0x19b9   : > { %v3316_v58 = vpop.f32.mrb[35].mxu1 }
0x19be   : > { %v2388_v60 = vpop.f32.mrb[36].mxu1 }
0x19bf   : > { %v2394_v61 = vadd.f32 %v2388_v60, %v5071_v47  ;;  %v3321_v62 = vpop.f32.mrb[37].mxu1 }
0x19c0   : > { %v2391_v63 = vpop.f32.mrb[38].mxu1 }
0x19c1   : > { %3627 = vtanh.f32 %v2394_v61  ;;  %v3322_v1 = vpop.f32.mrb[39].mxu1  ;;  %v3097_v3 = vmul.f32 -1.442695, %v2394_v61 }
0x19c3   : > { %3629 = vpow2.f32 %v3097_v3 }
0x19cb   : > { %v3628_v2 = vpop.eup %3627 }
0x19cc   : > { %2404 = vrot.lane.b32.xlu0 %v3628_v2, %s4230_s28 }
0x19cd   : > { %v3630_v4 = vpop.eup %3629 }
0x19ce   : > { %v2398_v5 = vadd.f32 1.0, %v3630_v4 }
0x19d0   : > { %3631 = vrcp.f32 %v2398_v5 }
0x19da   : > { %v3632_v6 = vpop.eup %3631 }
0x19db   : > { %v2402_v9 = vmul.f32 0.0, %v3632_v6 }
0x1a3e   : > { %v2405_v7 = vpop.permute.xlu0 %2404 }
0x1a3f   : > { %v2407_v8 = vmul.f32 %v3632_v6, %v2405_v7 }
0x1a41   : > { %2409 = vrot.lane.b32.xlu1 %v2407_v8, %s4233_s30 }
0x1ab3   : > { %v2410_v10 = vpop.permute.xlu1 %2409 }
0x1ab4   : > { %v2412_v11 = vadd.f32 %v2410_v10, %v2402_v9 }
0x1ab6   : > { %3633 = vtanh.f32 %v2412_v11  ;;  %v2478_v30 = vrot.slane %v2412_v11, 7 }
0x1ac0   : > { %v3634_v12 = vpop.eup %3633 }
0x1ac1   : > { %2415 = vrot.lane.b32.xlu1 %v3634_v12, %s4229_s0 }
0x1b33   : > { %v2416_v13 = vpop.permute.xlu1 %2415 }
0x1b34   : > { %v5077_v14 = vmul.f32 %v3632_v6, %v2416_v13 }
0x1b36   : > { %v2419_v15 = vpack.c.bf16 %v5077_v14, %v5077_v14 }
0x1b38   : > { %2421 = vrot.lane.b32.xlu0 %v2419_v15, %s4235_s27  ;;  %v3593_v15 = vld [vmem:[#allocation25] sm:$0xff]  }
0x1baa   : > { %v2422_v16 = vpop.permute.xlu0 %2421 }
0x1bab   : > { %3326 = vmatmul.mubr.msk.bf16.vlgmr.msra.gmra.mrb[36].mxu0 %vm1169_vm7, %v2422_v16  ;;  %v3594_v16 = vld [vmem:[#allocation25 + $0x8] sm:$0xff]  }
0x1bac   : > { %3336 = vmatpush3.bf16.msra.mxu0 %v3592_v43  ;;  %3337 = vmatprep.mubr.msk.bf16.mxu0 %vm4228_vm0, %v4227_v0 }
0x1c7e   : > { %v2460_v17 = vpop.f32.mrb[36].mxu0 }
0x1c7f   : > { %v2467_v18 = vrot.slane %v2460_v17, 7  ;;  %v3327_v19 = vpop.f32.mrb[37].mxu0 }
0x1c80   : > { %v2463_v20 = vpop.f32.mrb[38].mxu0 }
0x1c81   : > { %v2469_v21 = vadd.f32 %v2467_v18, %v5071_v47  ;;  %v3328_v22 = vpop.f32.mrb[39].mxu0 }
0x1c83   : > { %3635 = vtanh.f32 %v2469_v21  ;;  %v3099_v24 = vmul.f32 -1.442695, %v2469_v21  ;;  %v3595_v21 = vld [vmem:[#allocation25 + $0x10] sm:$0xff]  }
0x1c85   : > { %3637 = vpow2.f32 %v3099_v24 }
0x1c8d   : > { %v3636_v23 = vpop.eup %3635 }
0x1c8e   : > { %2482 = vrot.lane.b32.xlu1 %v3636_v23, %s4230_s28 }
0x1c8f   : > { %v3638_v25 = vpop.eup %3637 }
0x1c90   : > { %v2473_v26 = vadd.f32 1.0, %v3638_v25 }
0x1c92   : > { %3639 = vrcp.f32 %v2473_v26 }
0x1c9c   : > { %v3640_v27 = vpop.eup %3639 }
0x1c9d   : > { %v2480_v31 = vmul.f32 %v3640_v27, %v2478_v30 }
0x1d00   : > { %v2483_v28 = vpop.permute.xlu1 %2482 }
0x1d01   : > { %v2485_v29 = vmul.f32 %v3640_v27, %v2483_v28 }
0x1d03   : > { %2487 = vrot.lane.b32.xlu0 %v2485_v29, %s4233_s30 }
0x1d75   : > { %v2488_v32 = vpop.permute.xlu0 %2487 }
0x1d76   : > { %v2490_v33 = vadd.f32 %v2488_v32, %v2480_v31 }
0x1d78   : > { %3641 = vtanh.f32 %v2490_v33  ;;  %v2558_v55 = vrot.slane %v2490_v33, 7  ;;  %v2686_v33 = vld [vmem:[#allocation26] sm:$0x1] }
0x1d82   : > { %v3642_v34 = vpop.eup %3641 }
0x1d83   : > { %2493 = vrot.lane.b32.xlu1 %v3642_v34, %s4229_s0 }
0x1df5   : > { %v2494_v35 = vpop.permute.xlu1 %2493 }
0x1df6   : > { %v5089_v36 = vmul.f32 %v3640_v27, %v2494_v35 }
0x1df8   : > { %v2497_v37 = vpack.c.bf16 %v5089_v36, %v5089_v36  ;;  %v2661_v23 = vrot.slane %v5089_v36, 1 }
0x1dfa   : > { %v2499_v38 = vshrl.u32 %v2497_v37, 16 }
0x1dfc   : > { %2501 = vrot.lane.b32.xlu0 %v2499_v38, %s4235_s27 }
0x1e6e   : > { %v2502_v39 = vpop.permute.xlu0 %2501 }
0x1e6f   : > { %3332 = vmatmul.mubr.msk.bf16.vlgmr.msra.gmra.mrb[40].mxu1 %vm1169_vm7, %v2502_v39 }
0x1e70   : > { %3349 = vmatprep.mubr.msk.bf16.mxu1 %vm4228_vm0, %v4227_v0  ;;  %3342 = vmatpush3.bf16.msra.mxu1 %v3593_v15 }
0x1e71   : > { %3343 = vmatprep.subr.bf16.mxu1 %v4227_v0 }
0x1e74   : > { %3344 = vmatpush3.bf16.msra.mxu1 %v3594_v16 }
0x1e75   : > { %3345 = vmatprep.subr.bf16.mxu1 %v4227_v0 }
0x1e78   : > { %3346 = vmatpush3.bf16.msra.mxu1 %v3595_v21 }
0x1e79   : > { %3347 = vmatprep.subr.bf16.mxu1 %v4227_v0 }
0x1f42   : > { %v2540_v40 = vpop.f32.mrb[40].mxu1 }
0x1f43   : > { %v2547_v41 = vrot.slane %v2540_v40, 6  ;;  %v3333_v43 = vpop.f32.mrb[41].mxu1 }
0x1f44   : > { %v2543_v44 = vpop.f32.mrb[42].mxu1 }
0x1f45   : > { %v2549_v45 = vadd.f32 %v2547_v41, %v5071_v47  ;;  %v3334_v46 = vpop.f32.mrb[43].mxu1 }
0x1f47   : > { %3643 = vtanh.f32 %v2549_v45  ;;  %v3101_v49 = vmul.f32 -1.442695, %v2549_v45 }
0x1f49   : > { %3645 = vpow2.f32 %v3101_v49 }
0x1f51   : > { %v3644_v48 = vpop.eup %3643 }
0x1f52   : > { %2562 = vrot.lane.b32.xlu1 %v3644_v48, %s4230_s28 }
0x1f53   : > { %v3646_v50 = vpop.eup %3645 }
0x1f54   : > { %v2553_v51 = vadd.f32 1.0, %v3646_v50 }
0x1f56   : > { %3647 = vrcp.f32 %v2553_v51 }
0x1f60   : > { %v3648_v52 = vpop.eup %3647 }
0x1f61   : > { %v2560_v42 = vmul.f32 %v3648_v52, %v2558_v55 }
0x1fc4   : > { %v2563_v53 = vpop.permute.xlu1 %2562 }
0x1fc5   : > { %v2565_v54 = vmul.f32 %v3648_v52, %v2563_v53 }
0x1fc7   : > { %2567 = vrot.lane.b32.xlu0 %v2565_v54, %s4233_s30 }
0x2039   : > { %v2568_v56 = vpop.permute.xlu0 %2567 }
0x203a   : > { %v2570_v57 = vadd.f32 %v2568_v56, %v2560_v42 }
0x203c   : > { %3649 = vtanh.f32 %v2570_v57  ;;  %v2637_v17 = vrot.slane %v2570_v57, 7 }
0x2046   : > { %v3650_v58 = vpop.eup %3649 }
0x2047   : > { %2573 = vrot.lane.b32.xlu1 %v3650_v58, %s4229_s0 }
0x20b9   : > { %v2574_v59 = vpop.permute.xlu1 %2573 }
0x20ba   : > { %v2576_v60 = vmul.f32 %v3648_v52, %v2574_v59 }
0x20bc   : > { %v2577_v61 = vpack.c.bf16 %v2576_v60, %v2576_v60 }
0x20be   : > { %v2579_v62 = vrot.slane %v2577_v61, 1 }
0x20c0   : > { %2580 = vrot.lane.b32.xlu0 %v2579_v62, %s4235_s27 }
0x2132   : > { %v2581_v63 = vpop.permute.xlu0 %2580 }
0x2133   : > { %3338 = vmatmul.mubr.msk.bf16.vlgmr.msra.gmra.mrb[40].mxu0 %vm1169_vm7, %v2581_v63 }
0x2206   : > { %v2619_v1 = vpop.f32.mrb[40].mxu0 }
0x2207   : > { %v2626_v2 = vrot.slane %v2619_v1, 5  ;;  %v3339_v3 = vpop.f32.mrb[41].mxu0 }
0x2208   : > { %v2622_v4 = vpop.f32.mrb[42].mxu0 }
0x2209   : > { %v2628_v5 = vadd.f32 %v2626_v2, %v5071_v47  ;;  %v3340_v6 = vpop.f32.mrb[43].mxu0  ;;  %v2666_v47 = vrot.slane %v2576_v60, 2 }
0x220b   : > { %3651 = vtanh.f32 %v2628_v5  ;;  %v3103_v8 = vmul.f32 -1.442695, %v2628_v5 }
0x220d   : > { %3653 = vpow2.f32 %v3103_v8 }
0x2215   : > { %v3652_v7 = vpop.eup %3651 }
0x2216   : > { %2641 = vrot.lane.b32.xlu1 %v3652_v7, %s4230_s28 }
0x2217   : > { %v3654_v9 = vpop.eup %3653 }
0x2218   : > { %v2632_v10 = vadd.f32 1.0, %v3654_v9 }
0x221a   : > { %3655 = vrcp.f32 %v2632_v10 }
0x2224   : > { %v3656_v11 = vpop.eup %3655 }
0x2225   : > { %v2639_v18 = vmul.f32 %v3656_v11, %v2637_v17 }
0x2288   : > { %v2642_v12 = vpop.permute.xlu1 %2641 }
0x2289   : > { %v2644_v13 = vmul.f32 %v3656_v11, %v2642_v12 }
0x228b   : > { %2646 = vrot.lane.b32.xlu0 %v2644_v13, %s4233_s30  ;;  %s5282_s30 = sld [smem:[#allocation40_spill]] }
0x228f   : > { %2657 = vrot.lane.b32.xlu0 %v5077_v14, %s4235_s27  ;;  %v3596_v14 = vld [vmem:[#allocation25 + $0x18] sm:$0xff]   ;;  %s4236_s27 = smov [#allocation28]  }
0x2290   : > { %3348 = vmatpush3.bf16.msra.mxu1 %v3596_v14 }
0x2293   : > { %2667 = vrot.lane.b32.xlu0 %v2666_v47, %s4232_s5  ;;  %s5283_s5 = sld [smem:[#allocation45_spill]] }
0x2299   : > { %p5285_p10 = scmp.ne.s32.totalorder %s5283_s5, 0 }
0x22fd   : > { %v2647_v19 = vpop.permute.xlu0 %2646 }
0x22fe   : > { %v2649_v20 = vadd.f32 %v2647_v19, %v2639_v18 }
0x2300   : > { %3657 = vtanh.f32 %v2649_v20 }
0x2301   : > { %v2658_v24 = vpop.permute.xlu0 %2657 }
0x2305   : > { %v2668_v28 = vpop.permute.xlu0 %2667 }
0x230a   : > { %v3658_v22 = vpop.eup %3657 }
0x230b   : > { %2652 = vrot.lane.b32.xlu1 %v3658_v22, %s4229_s0  ;;  %s947_s0 = sand.u32 1, %s5282_s30   ;;  %s4111_s30 = sshll.u32 %s4236_s27, 4  ;;  %s4112_s30 = int_to_ptr.vmem [resolvable:$false] %s4111_s30 }
0x230c   : > { %s2757_s6 = scalar_lea.sflag [#allocation4], %s947_s0  ;;  %s4113_s8 = scalar_lea.vmem %s4112_s30, 32 }
0x230f   : > { %2662 = vrot.lane.b32.xlu1 %v2661_v23, %s4230_s28  ;;  %s948_s28 = scalar_lea.vmem [#allocation28], %s947_s0 }
0x2310   : > { %s2769_s1 = sshll.u32 %s948_s28, 4  ;;  %s5125_s1 = int_to_ptr.vmem [resolvable:$true] %s2769_s1 }
0x2311   : > { %s4107_s26 = scalar_lea.vmem %s5125_s1, 16  ;;  %p4114_p4 = scmp.lt.s32.totalorder %s5125_s1, %s4112_s30 }
0x2312   : > { %p4108_p12 = scmp.ne.s32.totalorder %s5125_s1, %s4107_s26  ;;  %p4115_p7 = scmp.lt.s32.totalorder %s4113_s8, %s4107_s26 }
0x2314   : > { %p4109_p2 = pnand %p4108_p12, %p5285_p10  ;;  %p4116_p8 = por %p4115_p7, %p4114_p4 }
0x2316   : > { %p4110_p3 = pneg %p4109_p2 }
0x2318   : > { %p4117_p11 = pnand %p4116_p8, %p4110_p3 }
0x237d   : > { %v2653_v25 = vpop.permute.xlu1 %2652 }
0x237e   : > { %v2655_v26 = vmul.f32 %v3656_v11, %v2653_v25 }
0x2380   : > { %v2671_v29 = vrot.slane %v2655_v26, 3 }
0x2381   : > { %v2663_v27 = vpop.permute.xlu1 %2662 }
0x2382   : > { %v2673_v0 = vsel %vm1169_vm7, %v2658_v24, %v2663_v27 }
0x2383   : > { %v2674_v30 = vsel %vm1116_vm6, %v2673_v0, %v2668_v28 }
0x2384   : > { %v2676_v31 = vsel %vm2675_vm10, %v2674_v30, %v2671_v29 }
0x2385   : > { %v2677_v32 = vpack.c.bf16 %v2676_v31, %v2676_v31 }
0x2387   : > { %3350 = vmatmul.mubr.msk.bf16.vlgmr.msra.gmra.mrb[44].mxu1 %vm988_vm1, %v2677_v32 }
0x245a   : > { %v2748_v34 = vpop.f32.mrb[44].mxu1 }
0x245b   : > { %v2749_v35 = vadd.f32 %v2748_v34, %v2686_v33  ;;  %v3351_v36 = vpop.f32.mrb[45].mxu1 }
0x245c   : > { %v2751_v37 = vpop.f32.mrb[46].mxu1 }
0x245d   : > { %v3352_v38 = vpop.f32.mrb[47].mxu1  ;;  %2755 = vst.msk [vmem:[%s948_s28] sm:$0x1] %vm2754_vm11, %v2749_v35 }
0x245e   : > { %4120 = shalt.err (!%p4117_p11)
}
0x245f   : > { %s4121_s0 = scalar_lea.hbm %s5123_s9, 16  ;;  %s4125_s24 = scalar_lea.hbm %s5284_s4, 32 }
0x2460   : > { %p4122_p13 = scmp.ne.s32.totalorder %s5123_s9, %s4121_s0  ;;  %p4126_p6 = scmp.lt.u32.totalorder %s5123_s9, %s5284_s4 }
0x2461   : > { %p4127_p5 = scmp.lt.u32.totalorder %s4125_s24, %s4121_s0  ;;  %p4129_p12 = scmp.lt.u32.totalorder %s4121_s0, %s5123_s9 }
0x2462   : > { %p4123_p0 = pnand %p4122_p13, %p5285_p10 }
0x2463   : > { %p4128_p9 = por %p4127_p5, %p4126_p6 }
0x2464   : > { %p4124_p1 = pneg %p4123_p0 }
0x2465   : > { %p4130_p2 = por %p4129_p12, %p4128_p9 }
0x2467   : > { %p4131_p3 = pnand %p4130_p2, %p4124_p1 }
0x2469   : > { %4134 = shalt.err (!%p4131_p3)
}
0x246a   : > { %3417 = dma.vmem_to_hbm [thread:$0]  (%p5285_p10), %s5125_s1, 16, %s5123_s9, %s2757_s6  }
0x246b PF: > { %s5286_s26 = sld [smem:[#allocation42_spill]]  ;;  %s5287_s8 = sld [smem:[#allocation39_spill]] }
0x246c   : > { %s5288_s3 = sld [smem:[#allocation46_spill]] }
0x2471   : > { %p3504_p4 = scmp.ge.s32.totalorder %s5286_s26, 2  ;;  %s2781_s28 = sand.u32 1, %s5287_s8  }
0x2472   : > { %p5289_p7 = scmp.ne.s32.totalorder %s5288_s3, 0  ;;  %s2782_s27 = scalar_lea.sflag [#allocation4], %s2781_s28 }
0x2474   : > { %p3469_p8 = pnand %p3504_p4, %p5289_p7 }
0x2476   : > { %4188 = dma.done.wait (!%p3469_p8), %s2782_s27, 16  }
0x2477   : > { %4190 = vsyncadd (!%p3469_p8), %s2782_s27, 4294967280  ;;  %s5290_s28 = sld [smem:[#allocation43_spill]]  ;;  %s5291_s5 = sld [smem:[#allocation40_spill]] }
0x2478   : > { %s5292_s26 = sld [smem:[#allocation41_spill]]  ;;  %s5293_s27 = sld [smem:[#allocation44_spill]] }
0x247d   : > { %p43_p11 = scmp.ge.s32.totalorder %s5290_s28, 4  }
0x247f   :  { %45 = sbr.rel (!%p43_p11) target bundleno = 26 (0x1a), region = 228 }
0x2486   :  { %2786 = vsyncpa [#allocation3], 1 }
0x2487   :  { %2788 = vsyncpa [#allocation3 + $0x1], 1 }
0x2488   :  { %2789 = vsyncpa [#allocation6], 1 }
0x2489   :  { %2790 = vsyncpa [#allocation9], 1 }
0x248a   :  { %2791 = vsyncpa [#allocation12], 1 }
0x248b   :  { %2792 = vsyncpa [#allocation15], 1 }
0x248c   :  { %2793 = vsyncpa [#allocation18], 1 }
0x248d   :  { %2794 = vsyncpa [#allocation21], 1 }
0x248e   :  { %2795 = vsyncpa [#allocation24], 1 }
0x248f   :  { %2796 = vsyncpa [#allocation27], 1 }
0x2490   :  { %2797 = vsyncpa [#allocation4], 1 }
0x2491   :  { %2799 = vsyncpa [#allocation4 + $0x1], 1 }

</bundles_post_ra>
